<compile_context>
chip_gen: v7x
topology: tpu7x:2x2x1
jax: 0.10.0
libtpu: 0.0.40
codegen_flags: <defaults>
</compile_context>

<pallas_src>
import numpy as np
import jax
import jax.numpy as jnp
from jax.experimental import pallas as pl
from jax.experimental.pallas import tpu as pltpu

# ----------------------------- graph definition -----------------------------
edges = [(1, 4, 415.44, 203.2), (1, 8, 46.02, 101.6), (2, 3, 270.66, 152.4),
         (2, 11, 47.24, 101.6), (2, 13, 94.18, 101.6), (3, 17, 213.06, 25.4),
         (3, 18, 350.83, 152.4), (4, 5, 334.67, 152.4), (5, 6, 176.17, 152.4),
         (5, 21, 186.23, 152.4), (6, 7, 28.96, 152.4), (7, 8, 127.71, 76.2),
         (7, 29, 63.4, 152.4), (8, 30, 33.53, 50.8), (9, 10, 137.47, 152.4),
         (9, 12, 17.98, 50.8), (9, 25, 126.8, 152.4), (11, 15, 92.35, 304.8),
         (12, 11, 250.85, 25.4), (13, 14, 233.48, 203.2), (14, 23, 116.43, 25.4),
         (15, 16, 231.04, 254.0), (15, 17, 307.54, 25.4), (18, 19, 124.36, 152.4),
         (18, 24, 359.97, 25.4), (21, 20, 34.44, 25.4), (22, 13, 213.67, 152.4),
         (23, 22, 106.99, 152.4), (24, 19, 294.74, 152.4), (26, 9, 82.6, 76.2),
         (26, 27, 96.62, 152.4), (26, 28, 129.24, 152.4), (29, 26, 222.5, 152.4)]

nodes = {1: (4234.93, 4513.14), 2: (6939.72, 7557.96), 3: (8531.68, 9644.51),
         4: (200.93, 3508.5), 5: (1267.39, 4497.68), 6: (1916.54, 5146.83),
         7: (2720.25, 5780.53), 8: (3400.31, 5224.11), 9: (4806.8, 8114.37),
         10: (5363.21, 7635.24), 11: (5919.63, 8315.3), 12: (5301.39, 8639.88),
         13: (6460.59, 6429.68), 14: (6429.68, 4559.51), 15: (6707.88, 9211.75),
         16: (5734.16, 9907.26), 17: (7573.42, 10154.56), 18: (9026.28, 6491.5),
         19: (10540.96, 6491.5), 20: (2812.98, 4636.79), 21: (2009.27, 3848.53),
         22: (7619.78, 6429.68), 23: (7697.06, 4574.96), 24: (9814.53, 4930.45),
         25: (4095.83, 8825.35), 26: (4173.11, 7387.94), 27: (4729.52, 6939.72),
         28: (3384.85, 8129.83), 29: (3400.31, 6615.15), 30: (4018.55, 6151.47)}

N = 30          # real graph nodes
NPAD = 32       # sublane-aligned node count inside the kernel
IN_C = 1        # in_channels  (x = coords[:, 0] -> one scalar feature per node)
HID = 32        # hidden_channels
OUT_C = 8       # out_channels
HEADS = 2       # GAT heads
LANES = 128     # lane width of the packed buffer / activation slabs
NEG_SLOPE = 0.2 # GAT leaky_relu slope (PyG default)
NEG_BIG = -1e30 # additive mask value


# -------------------- packed buffer layout (static, host+kernel) --------------------
def _make_layout():
    """Every block lives at an 8-aligned row offset of a (P_ROWS, 128) f32 buffer."""
    layout = {}
    cur = 0

    def place(name, rows):
        nonlocal cur
        layout[name] = (cur, rows)
        cur += ((rows + 7) // 8) * 8

    place("anorm", NPAD)        # (32, lanes 0:32)  normalized adjacency [target, source]
    place("x", NPAD)            # (32, lane 0)      node feature column
    place("w1", 1)              # (1, lanes 0:32)   GCN1 weight (rank-1)
    place("b1", 1)              # (1, lanes 0:32)
    place("w2", HID)            # (32, lanes 0:32)  GCN2 weight
    place("b2", 1)
    place("wa1", HID)           # (32, lanes 0:64)  GAT1 weight, head h at lanes h*32:(h+1)*32
    place("ad1t", HEADS)        # (2, 128) row h = att_dst[h] placed at its head's lanes
    place("as1t", HEADS)        # (2, 128) row h = att_src[h] placed at its head's lanes
    place("ba1", 1)             # (1, lanes 0:64)   GAT1 bias (concat)
    place("wa2", 2 * HID)       # (64, lanes 0:16)  GAT2 weight, head h at lanes h*8:(h+1)*8
    place("ad2t", HEADS)
    place("as2t", HEADS)
    place("g2", 2 * OUT_C)      # (16, 128) gather: col c = row c + row 8+c  (head mean)
    place("bout", 1)            # (1, 128): ba2 at lanes 0:8, -1e30 at lanes 8:128
    return layout, cur


P_LAYOUT, P_ROWS = _make_layout()       # P_ROWS = 280


# ---------------------------- host-side graph / packing ----------------------------
def build_graph():
    """Dense GCN-normalized adjacency D^-1/2 (A+I) D^-1/2, zero-padded to NPAD.

    Padded rows/cols are exactly zero, so padded nodes never contribute to real nodes
    (and the in-kernel GAT mask `anorm > 0` automatically excludes them)."""
    A = np.zeros((NPAD, NPAD), dtype=np.float32)
    for (s, t, _, _) in edges:
        A[t - 1, s - 1] = 1.0                     # [target, source], directed
    A[:N, :N] += np.eye(N, dtype=np.float32)      # self loops for real nodes only
    deg = A.sum(axis=1)
    dinv = np.where(deg > 0, 1.0 / np.sqrt(deg), 0.0).astype(np.float32)
    return (dinv[:, None] * A * dinv[None, :]).astype(np.float32)


def glorot(key, shape):
    fan_in, fan_out = shape[0], shape[-1]
    scale = jnp.sqrt(2.0 / (fan_in + fan_out))
    return scale * jax.random.normal(key, shape, dtype=jnp.float32)


def init_params(key):
    ks = jax.random.split(key, 8)
    w1 = glorot(ks[0], (IN_C, HID));            b1 = jnp.zeros((1, HID), jnp.float32)
    w2 = glorot(ks[1], (HID, HID));             b2 = jnp.zeros((1, HID), jnp.float32)
    wa1 = glorot(ks[2], (HID, HEADS * HID))
    as1 = glorot(ks[3], (HEADS, HID));          ad1 = glorot(ks[4], (HEADS, HID))
    ba1 = jnp.zeros((1, HEADS * HID), jnp.float32)
    wa2 = glorot(ks[5], (HEADS * HID, HEADS * OUT_C))
    as2 = glorot(ks[6], (HEADS, OUT_C));        ad2 = glorot(ks[7], (HEADS, OUT_C))
    ba2 = jnp.zeros((1, OUT_C), jnp.float32)
    return (w1, b1, w2, b2, wa1, as1, ad1, ba1, wa2, as2, ad2, ba2)


def pack_all(x_np, anorm_np, params):
    """Pack features + adjacency + all 12 parameter tensors into one (P_ROWS, 128) buffer."""
    (w1, b1, w2, b2, wa1, as1, ad1, ba1, wa2, as2, ad2, ba2) = \
        [np.asarray(p, np.float32) for p in params]
    buf = np.zeros((P_ROWS, LANES), dtype=np.float32)

    def put(name, arr):
        off, rows = P_LAYOUT[name]
        r, c = arr.shape
        assert r <= rows and c <= LANES
        buf[off:off + r, :c] = arr

    put("anorm", np.asarray(anorm_np, np.float32))
    put("x", np.asarray(x_np, np.float32))
    put("w1", w1); put("b1", b1); put("w2", w2); put("b2", b2)
    put("wa1", wa1)                                   # (32, 64): head h at lanes h*32:(h+1)*32
    ad1t = np.zeros((HEADS, LANES), np.float32)
    as1t = np.zeros((HEADS, LANES), np.float32)
    for hd in range(HEADS):
        ad1t[hd, hd * HID:(hd + 1) * HID] = ad1[hd]
        as1t[hd, hd * HID:(hd + 1) * HID] = as1[hd]
    put("ad1t", ad1t); put("as1t", as1t)
    put("ba1", ba1)
    put("wa2", wa2)                                   # (64, 16): head h at lanes h*8:(h+1)*8
    ad2t = np.zeros((HEADS, LANES), np.float32)
    as2t = np.zeros((HEADS, LANES), np.float32)
    for hd in range(HEADS):
        ad2t[hd, hd * OUT_C:(hd + 1) * OUT_C] = ad2[hd]
        as2t[hd, hd * OUT_C:(hd + 1) * OUT_C] = as2[hd]
    put("ad2t", ad2t); put("as2t", as2t)
    g2 = np.zeros((2 * OUT_C, LANES), np.float32)     # gathers the two heads into lanes 0:8
    for c in range(OUT_C):
        g2[c, c] = 1.0
        g2[OUT_C + c, c] = 1.0
    put("g2", g2)
    bout = np.full((1, LANES), NEG_BIG, np.float32)   # -1e30 on lanes >= OUT_C for log_softmax
    bout[0, :OUT_C] = ba2[0]
    put("bout", bout)
    return jnp.asarray(buf)


# ------------------------------- Pallas kernel -------------------------------
def gcn_gat_kernel(p_ref, out_ref):
    f32 = jnp.float32

    def blk(name):
        off, rows = P_LAYOUT[name]
        return p_ref[off:off + rows, :]               # static 8-aligned row slice -> (rows, 128)

    A = blk("anorm")[:, :NPAD]                        # (32, 32)  [target, source]
    xcol = blk("x")[:, :IN_C]                         # (32, 1)

    # hoisted loop invariants (shared by all 4 attention softmaxes)
    lane = jax.lax.broadcasted_iota(jnp.int32, (NPAD, LANES), 1)
    neg_mask = jnp.where(A > 0.0, 0.0, NEG_BIG)       # (32, 32) additive GAT edge mask

    # ---- GCNConv 1 :  A @ (x w1) + b1  ==  (A @ x) * w1 + b1   (rank-1 re-association)
    t = jnp.dot(A, xcol, preferred_element_type=f32)                       # (32, 1)
    h = jnp.maximum(t * blk("w1") + blk("b1"), 0.0)                        # (32,128); lanes>=32 stay 0

    # ---- GCNConv 2 :  relu(A @ (h w2) + b2)
    hw = jnp.dot(h[:, :HID], blk("w2"), preferred_element_type=f32)        # (32,128)
    h = jnp.maximum(jnp.dot(A, hw, preferred_element_type=f32) + blk("b2"), 0.0)

    def gat_layer(feat, w_name, ad_name, as_name, width):
        """One GATConv with both heads fused.

        feat: (32, feat_w) activations; the weight block has feat_w rows with head h's
        output columns at lanes [h*width, (h+1)*width).  Returns a (32,128) slab with
        head0's aggregation in lanes [0,width), head1's in [width, 2*width), zeros above."""
        xp = jnp.dot(feat, blk(w_name), preferred_element_type=f32)        # (32,128), both heads
        # attention coefficients of BOTH heads: one dst matmul + one src matmul
        dst = jnp.einsum("nc,hc->nh", xp, blk(ad_name),
                         preferred_element_type=f32)                       # (32, 2)
        src = jnp.einsum("hc,nc->hn", blk(as_name), xp,
                         preferred_element_type=f32)                       # (2, 32)
        outs = []
        for hd in range(HEADS):
            logits = dst[:, hd:hd + 1] + src[hd:hd + 1, :]                 # (32,32) [target, source]
            logits = jnp.maximum(logits, NEG_SLOPE * logits) + neg_mask    # leaky_relu + edge mask
            m = jnp.max(logits, axis=-1, keepdims=True)
            e = jnp.exp(logits - m)
            attn = e * pl.reciprocal(jnp.sum(e, axis=-1, keepdims=True), approx=True)
            outs.append(jnp.dot(attn, xp, preferred_element_type=f32))     # (32,128)
        # de-interleave heads: head0 keeps lanes < width, head1 keeps lanes >= width
        return jnp.where(lane < width, outs[0], outs[1])

    # ---- GATConv 1 (heads=2, concat=True) + relu
    g = gat_layer(h[:, :HID], "wa1", "ad1t", "as1t", HID)                  # heads at lanes 0:32 / 32:64
    g = jnp.maximum(g + blk("ba1"), 0.0)                                   # lanes >= 64 stay exactly 0

    # ---- GATConv 2 (heads=2, concat=False => mean over heads)
    s = gat_layer(g[:, :HEADS * HID], "wa2", "ad2t", "as2t", OUT_C)        # heads at lanes 0:8 / 8:16
    # gather both heads into lanes 0:8 (mean), add bias, put -1e30 on lanes >= 8
    h2 = 0.5 * jnp.dot(s[:, :HEADS * OUT_C], blk("g2"),
                       preferred_element_type=f32) + blk("bout")           # (32,128)

    # ---- log_softmax over the 128-lane slab (masked lanes vanish); lane-dense store
    m = jnp.max(h2, axis=-1, keepdims=True)
    z = h2 - m
    out_ref[...] = z - jnp.log(jnp.sum(jnp.exp(z), axis=-1, keepdims=True))


@jax.jit
def gcn_with_attention(packed):
    vmem = lambda: pl.BlockSpec(memory_space=pltpu.MemorySpace.VMEM)
    # single grid point, one TensorCore; returns the padded lane-dense slab (slice on host)
    return pl.pallas_call(
        gcn_gat_kernel,
        out_shape=jax.ShapeDtypeStruct((NPAD, LANES), jnp.float32),
        in_specs=[vmem()],
        out_specs=vmem(),
    )(packed)


# ------------------------------ pure-JAX reference ------------------------------
def forward_ref(x, anorm, params):
    """Dense pure-JAX reference of GCNWithAttention.forward (exact softmax reciprocal)."""
    (w1, b1, w2, b2, wa1, as1, ad1, ba1, wa2, as2, ad2, ba2) = params
    neg = jnp.where(anorm > 0.0, 0.0, NEG_BIG)
    h = jax.nn.relu(anorm @ (x @ w1) + b1)
    h = jax.nn.relu(anorm @ (h @ w2) + b2)

    def gat(feat, w, a_src, a_dst, width):
        outs = []
        for hd in range(HEADS):
            xp = feat @ w[:, hd * width:(hd + 1) * width]
            sl = xp @ a_src[hd]
            dl = xp @ a_dst[hd]
            logit = dl[:, None] + sl[None, :]
            logit = jnp.where(logit > 0, logit, NEG_SLOPE * logit) + neg
            attn = jax.nn.softmax(logit, axis=-1)
            outs.append(attn @ xp)
        return outs

    o1 = gat(h, wa1, as1, ad1, HID)
    g = jax.nn.relu(jnp.concatenate(o1, axis=1) + ba1)
    o2 = gat(g, wa2, as2, ad2, OUT_C)
    h2 = (o2[0] + o2[1]) / HEADS + ba2
    return jax.nn.log_softmax(h2, axis=-1)


# ------------------------------------ main ------------------------------------
if __name__ == "__main__":
    coords = np.array(list(nodes.values()), dtype=np.float32)
    # node feature = x coordinate, scaled to a sane numeric range; zero-padded to NPAD
    x_np = np.zeros((NPAD, IN_C), dtype=np.float32)
    x_np[:N, 0] = coords[:, 0] / 1000.0

    anorm_np = build_graph()
    # invariants the in-kernel GAT mask (anorm > 0) and zero-padding rely on:
    assert np.all(anorm_np[N:, :] == 0.0) and np.all(anorm_np[:, N:] == 0.0)
    assert np.count_nonzero(anorm_np) == len(edges) + N   # every edge/self-loop strictly > 0

    key = jax.random.PRNGKey(0)
    params = init_params(key)
    packed = pack_all(x_np, anorm_np, params)

    out_pad = jax.block_until_ready(gcn_with_attention(packed))   # (32, 128) lane-dense slab
    out = np.asarray(out_pad)[:N, :OUT_C]                         # host-side slice (no device op)

    ref = np.asarray(forward_ref(jnp.asarray(x_np), jnp.asarray(anorm_np), params))[:N, :OUT_C]

    assert out.shape == (N, OUT_C)
    assert np.all(np.isfinite(out))
    # rows of log_softmax must (approximately) sum to probability 1
    assert np.allclose(np.exp(out).sum(axis=1), 1.0, atol=1e-4)
    # match the exact-arithmetic reference; tolerance covers approx softmax reciprocal
    assert np.allclose(out, ref, atol=5e-2), float(np.max(np.abs(out - ref)))
    print("KERNEL_OK")
</pallas_src>

<mosaic_0001>
module attributes {stable_mosaic.version = 11 : i64} {
  func.func @gcn_gat_kernel(%arg0: memref<280x128xf32, #tpu.memory_space<vmem>>, %arg1: memref<32x128xf32, #tpu.memory_space<vmem>>) attributes {dimension_semantics = [], scalar_prefetch = 0 : i64, scratch_operands = 0 : i64, tpu.core_type = #tpu.core_type<tc>} {
    %c0 = arith.constant 0 : index
    %c0_0 = arith.constant 0 : index
    %0 = vector.load %arg0[%c0, %c0_0] : memref<280x128xf32, #tpu.memory_space<vmem>>, vector<32x128xf32>
    %1 = vector.extract_strided_slice %0 {offsets = [0, 0], sizes = [32, 32], strides = [1, 1]} : vector<32x128xf32> to vector<32x32xf32>
    %c32 = arith.constant 32 : index
    %c0_1 = arith.constant 0 : index
    %2 = vector.load %arg0[%c32, %c0_1] : memref<280x128xf32, #tpu.memory_space<vmem>>, vector<32x128xf32>
    %3 = vector.extract_strided_slice %2 {offsets = [0, 0], sizes = [32, 1], strides = [1, 1]} : vector<32x128xf32> to vector<32x1xf32>
    %4 = tpu.iota {dimensions = array<i32: 1>} : vector<32x128xi32>
    %cst = arith.constant 0.000000e+00 : f32
    %5 = vector.broadcast %cst : f32 to vector<32x32xf32>
    %6 = arith.cmpf ogt, %1, %5 : vector<32x32xf32>
    %cst_2 = arith.constant 0.000000e+00 : f32
    %cst_3 = arith.constant -1.000000e+30 : f32
    %7 = vector.broadcast %cst_2 : f32 to vector<32x32xf32>
    %8 = vector.broadcast %cst_3 : f32 to vector<32x32xf32>
    %9 = arith.select %6, %7, %8 : vector<32x32xi1>, vector<32x32xf32>
    %cst_4 = arith.constant dense<0.000000e+00> : vector<32x1xf32>
    %10 = tpu.matmul %1, %3, %cst_4 {dimension_numbers = #tpu.dot_dimension_numbers<[1], [0], [0], [1], [0, 0, 1, 1], [], []>} : vector<32x32xf32>, vector<32x1xf32>, vector<32x1xf32> -> vector<32x1xf32>
    %c64 = arith.constant 64 : index
    %c0_5 = arith.constant 0 : index
    %11 = vector.load %arg0[%c64, %c0_5] : memref<280x128xf32, #tpu.memory_space<vmem>>, vector<1x128xf32>
    %12 = vector.broadcast %10 : vector<32x1xf32> to vector<32x128xf32>
    %13 = vector.broadcast %11 : vector<1x128xf32> to vector<32x128xf32>
    %14 = arith.mulf %12, %13 : vector<32x128xf32>
    %c72 = arith.constant 72 : index
    %c0_6 = arith.constant 0 : index
    %15 = vector.load %arg0[%c72, %c0_6] : memref<280x128xf32, #tpu.memory_space<vmem>>, vector<1x128xf32>
    %16 = vector.broadcast %15 : vector<1x128xf32> to vector<32x128xf32>
    %17 = arith.addf %14, %16 : vector<32x128xf32>
    %cst_7 = arith.constant 0.000000e+00 : f32
    %18 = vector.broadcast %cst_7 : f32 to vector<32x128xf32>
    %19 = arith.maximumf %17, %18 : vector<32x128xf32>
    %20 = vector.extract_strided_slice %19 {offsets = [0, 0], sizes = [32, 32], strides = [1, 1]} : vector<32x128xf32> to vector<32x32xf32>
    %c80 = arith.constant 80 : index
    %c0_8 = arith.constant 0 : index
    %21 = vector.load %arg0[%c80, %c0_8] : memref<280x128xf32, #tpu.memory_space<vmem>>, vector<32x128xf32>
    %cst_9 = arith.constant dense<0.000000e+00> : vector<32x128xf32>
    %22 = tpu.matmul %20, %21, %cst_9 {dimension_numbers = #tpu.dot_dimension_numbers<[1], [0], [0], [1], [0, 0, 1, 1], [], []>} : vector<32x32xf32>, vector<32x128xf32>, vector<32x128xf32> -> vector<32x128xf32>
    %cst_10 = arith.constant dense<0.000000e+00> : vector<32x128xf32>
    %23 = tpu.matmul %1, %22, %cst_10 {dimension_numbers = #tpu.dot_dimension_numbers<[1], [0], [0], [1], [0, 0, 1, 1], [], []>} : vector<32x32xf32>, vector<32x128xf32>, vector<32x128xf32> -> vector<32x128xf32>
    %c112 = arith.constant 112 : index
    %c0_11 = arith.constant 0 : index
    %24 = vector.load %arg0[%c112, %c0_11] : memref<280x128xf32, #tpu.memory_space<vmem>>, vector<1x128xf32>
    %25 = vector.broadcast %24 : vector<1x128xf32> to vector<32x128xf32>
    %26 = arith.addf %23, %25 : vector<32x128xf32>
    %cst_12 = arith.constant 0.000000e+00 : f32
    %27 = vector.broadcast %cst_12 : f32 to vector<32x128xf32>
    %28 = arith.maximumf %26, %27 : vector<32x128xf32>
    %29 = vector.extract_strided_slice %28 {offsets = [0, 0], sizes = [32, 32], strides = [1, 1]} : vector<32x128xf32> to vector<32x32xf32>
    %c120 = arith.constant 120 : index
    %c0_13 = arith.constant 0 : index
    %30 = vector.load %arg0[%c120, %c0_13] : memref<280x128xf32, #tpu.memory_space<vmem>>, vector<32x128xf32>
    %cst_14 = arith.constant dense<0.000000e+00> : vector<32x128xf32>
    %31 = tpu.matmul %29, %30, %cst_14 {dimension_numbers = #tpu.dot_dimension_numbers<[1], [0], [0], [1], [0, 0, 1, 1], [], []>} : vector<32x32xf32>, vector<32x128xf32>, vector<32x128xf32> -> vector<32x128xf32>
    %c152 = arith.constant 152 : index
    %c0_15 = arith.constant 0 : index
    %32 = vector.load %arg0[%c152, %c0_15] : memref<280x128xf32, #tpu.memory_space<vmem>>, vector<2x128xf32>
    "tpu.trace_start"() <{level = 10 : i32, message = "nc,hc->nh"}> : () -> ()
    %cst_16 = arith.constant dense<0.000000e+00> : vector<32x2xf32>
    %33 = tpu.matmul %31, %32, %cst_16 {dimension_numbers = #tpu.dot_dimension_numbers<[1], [1], [0], [0], [0, 0, 1, 0], [], []>} : vector<32x128xf32>, vector<2x128xf32>, vector<32x2xf32> -> vector<32x2xf32>
    "tpu.trace_stop"() : () -> ()
    %c160 = arith.constant 160 : index
    %c0_17 = arith.constant 0 : index
    %34 = vector.load %arg0[%c160, %c0_17] : memref<280x128xf32, #tpu.memory_space<vmem>>, vector<2x128xf32>
    "tpu.trace_start"() <{level = 10 : i32, message = "hc,nc->hn"}> : () -> ()
    %cst_18 = arith.constant dense<0.000000e+00> : vector<2x32xf32>
    %35 = tpu.matmul %34, %31, %cst_18 {dimension_numbers = #tpu.dot_dimension_numbers<[1], [1], [0], [0], [0, 0, 1, 0], [], []>} : vector<2x128xf32>, vector<32x128xf32>, vector<2x32xf32> -> vector<2x32xf32>
    "tpu.trace_stop"() : () -> ()
    %36 = vector.extract_strided_slice %33 {offsets = [0, 0], sizes = [32, 1], strides = [1, 1]} : vector<32x2xf32> to vector<32x1xf32>
    %37 = vector.extract_strided_slice %35 {offsets = [0, 0], sizes = [1, 32], strides = [1, 1]} : vector<2x32xf32> to vector<1x32xf32>
    %38 = vector.broadcast %36 : vector<32x1xf32> to vector<32x32xf32>
    %39 = vector.broadcast %37 : vector<1x32xf32> to vector<32x32xf32>
    %40 = arith.addf %38, %39 : vector<32x32xf32>
    %cst_19 = arith.constant 2.000000e-01 : f32
    %41 = vector.broadcast %cst_19 : f32 to vector<32x32xf32>
    %42 = arith.mulf %41, %40 : vector<32x32xf32>
    %43 = arith.maximumf %40, %42 : vector<32x32xf32>
    %44 = arith.addf %43, %9 : vector<32x32xf32>
    %cst_20 = arith.constant dense<0xFF800000> : vector<32xf32>
    %45 = vector.multi_reduction <maximumf>, %44, %cst_20 [1] : vector<32x32xf32> to vector<32xf32>
    %46 = vector.shape_cast %45 : vector<32xf32> to vector<32x1xf32>
    %47 = vector.broadcast %46 : vector<32x1xf32> to vector<32x32xf32>
    %48 = arith.subf %44, %47 : vector<32x32xf32>
    %49 = math.exp %48 : vector<32x32xf32>
    %cst_21 = arith.constant dense<0.000000e+00> : vector<32xf32>
    %50 = vector.multi_reduction <add>, %49, %cst_21 [1] : vector<32x32xf32> to vector<32xf32>
    %51 = vector.shape_cast %50 : vector<32xf32> to vector<32x1xf32>
    %52 = tpu.reciprocal %51 {approx = true} : vector<32x1xf32> -> vector<32x1xf32>
    %53 = vector.broadcast %52 : vector<32x1xf32> to vector<32x32xf32>
    %54 = arith.mulf %49, %53 : vector<32x32xf32>
    %cst_22 = arith.constant dense<0.000000e+00> : vector<32x128xf32>
    %55 = tpu.matmul %54, %31, %cst_22 {dimension_numbers = #tpu.dot_dimension_numbers<[1], [0], [0], [1], [0, 0, 1, 1], [], []>} : vector<32x32xf32>, vector<32x128xf32>, vector<32x128xf32> -> vector<32x128xf32>
    %56 = vector.extract_strided_slice %33 {offsets = [0, 1], sizes = [32, 1], strides = [1, 1]} : vector<32x2xf32> to vector<32x1xf32>
    %57 = vector.extract_strided_slice %35 {offsets = [1, 0], sizes = [1, 32], strides = [1, 1]} : vector<2x32xf32> to vector<1x32xf32>
    %58 = vector.broadcast %56 : vector<32x1xf32> to vector<32x32xf32>
    %59 = vector.broadcast %57 : vector<1x32xf32> to vector<32x32xf32>
    %60 = arith.addf %58, %59 : vector<32x32xf32>
    %cst_23 = arith.constant 2.000000e-01 : f32
    %61 = vector.broadcast %cst_23 : f32 to vector<32x32xf32>
    %62 = arith.mulf %61, %60 : vector<32x32xf32>
    %63 = arith.maximumf %60, %62 : vector<32x32xf32>
    %64 = arith.addf %63, %9 : vector<32x32xf32>
    %cst_24 = arith.constant dense<0xFF800000> : vector<32xf32>
    %65 = vector.multi_reduction <maximumf>, %64, %cst_24 [1] : vector<32x32xf32> to vector<32xf32>
    %66 = vector.shape_cast %65 : vector<32xf32> to vector<32x1xf32>
    %67 = vector.broadcast %66 : vector<32x1xf32> to vector<32x32xf32>
    %68 = arith.subf %64, %67 : vector<32x32xf32>
    %69 = math.exp %68 : vector<32x32xf32>
    %cst_25 = arith.constant dense<0.000000e+00> : vector<32xf32>
    %70 = vector.multi_reduction <add>, %69, %cst_25 [1] : vector<32x32xf32> to vector<32xf32>
    %71 = vector.shape_cast %70 : vector<32xf32> to vector<32x1xf32>
    %72 = tpu.reciprocal %71 {approx = true} : vector<32x1xf32> -> vector<32x1xf32>
    %73 = vector.broadcast %72 : vector<32x1xf32> to vector<32x32xf32>
    %74 = arith.mulf %69, %73 : vector<32x32xf32>
    %cst_26 = arith.constant dense<0.000000e+00> : vector<32x128xf32>
    %75 = tpu.matmul %74, %31, %cst_26 {dimension_numbers = #tpu.dot_dimension_numbers<[1], [0], [0], [1], [0, 0, 1, 1], [], []>} : vector<32x32xf32>, vector<32x128xf32>, vector<32x128xf32> -> vector<32x128xf32>
    %c32_i32 = arith.constant 32 : i32
    %76 = vector.broadcast %c32_i32 : i32 to vector<32x128xi32>
    %77 = arith.cmpi slt, %4, %76 : vector<32x128xi32>
    %78 = arith.select %77, %55, %75 : vector<32x128xi1>, vector<32x128xf32>
    %c168 = arith.constant 168 : index
    %c0_27 = arith.constant 0 : index
    %79 = vector.load %arg0[%c168, %c0_27] : memref<280x128xf32, #tpu.memory_space<vmem>>, vector<1x128xf32>
    %80 = vector.broadcast %79 : vector<1x128xf32> to vector<32x128xf32>
    %81 = arith.addf %78, %80 : vector<32x128xf32>
    %cst_28 = arith.constant 0.000000e+00 : f32
    %82 = vector.broadcast %cst_28 : f32 to vector<32x128xf32>
    %83 = arith.maximumf %81, %82 : vector<32x128xf32>
    %84 = vector.extract_strided_slice %83 {offsets = [0, 0], sizes = [32, 64], strides = [1, 1]} : vector<32x128xf32> to vector<32x64xf32>
    %c176 = arith.constant 176 : index
    %c0_29 = arith.constant 0 : index
    %85 = vector.load %arg0[%c176, %c0_29] : memref<280x128xf32, #tpu.memory_space<vmem>>, vector<64x128xf32>
    %cst_30 = arith.constant dense<0.000000e+00> : vector<32x128xf32>
    %86 = tpu.matmul %84, %85, %cst_30 {dimension_numbers = #tpu.dot_dimension_numbers<[1], [0], [0], [1], [0, 0, 1, 1], [], []>} : vector<32x64xf32>, vector<64x128xf32>, vector<32x128xf32> -> vector<32x128xf32>
    %c240 = arith.constant 240 : index
    %c0_31 = arith.constant 0 : index
    %87 = vector.load %arg0[%c240, %c0_31] : memref<280x128xf32, #tpu.memory_space<vmem>>, vector<2x128xf32>
    "tpu.trace_start"() <{level = 10 : i32, message = "nc,hc->nh"}> : () -> ()
    %cst_32 = arith.constant dense<0.000000e+00> : vector<32x2xf32>
    %88 = tpu.matmul %86, %87, %cst_32 {dimension_numbers = #tpu.dot_dimension_numbers<[1], [1], [0], [0], [0, 0, 1, 0], [], []>} : vector<32x128xf32>, vector<2x128xf32>, vector<32x2xf32> -> vector<32x2xf32>
    "tpu.trace_stop"() : () -> ()
    %c248 = arith.constant 248 : index
    %c0_33 = arith.constant 0 : index
    %89 = vector.load %arg0[%c248, %c0_33] : memref<280x128xf32, #tpu.memory_space<vmem>>, vector<2x128xf32>
    "tpu.trace_start"() <{level = 10 : i32, message = "hc,nc->hn"}> : () -> ()
    %cst_34 = arith.constant dense<0.000000e+00> : vector<2x32xf32>
    %90 = tpu.matmul %89, %86, %cst_34 {dimension_numbers = #tpu.dot_dimension_numbers<[1], [1], [0], [0], [0, 0, 1, 0], [], []>} : vector<2x128xf32>, vector<32x128xf32>, vector<2x32xf32> -> vector<2x32xf32>
    "tpu.trace_stop"() : () -> ()
    %91 = vector.extract_strided_slice %88 {offsets = [0, 0], sizes = [32, 1], strides = [1, 1]} : vector<32x2xf32> to vector<32x1xf32>
    %92 = vector.extract_strided_slice %90 {offsets = [0, 0], sizes = [1, 32], strides = [1, 1]} : vector<2x32xf32> to vector<1x32xf32>
    %93 = vector.broadcast %91 : vector<32x1xf32> to vector<32x32xf32>
    %94 = vector.broadcast %92 : vector<1x32xf32> to vector<32x32xf32>
    %95 = arith.addf %93, %94 : vector<32x32xf32>
    %cst_35 = arith.constant 2.000000e-01 : f32
    %96 = vector.broadcast %cst_35 : f32 to vector<32x32xf32>
    %97 = arith.mulf %96, %95 : vector<32x32xf32>
    %98 = arith.maximumf %95, %97 : vector<32x32xf32>
    %99 = arith.addf %98, %9 : vector<32x32xf32>
    %cst_36 = arith.constant dense<0xFF800000> : vector<32xf32>
    %100 = vector.multi_reduction <maximumf>, %99, %cst_36 [1] : vector<32x32xf32> to vector<32xf32>
    %101 = vector.shape_cast %100 : vector<32xf32> to vector<32x1xf32>
    %102 = vector.broadcast %101 : vector<32x1xf32> to vector<32x32xf32>
    %103 = arith.subf %99, %102 : vector<32x32xf32>
    %104 = math.exp %103 : vector<32x32xf32>
    %cst_37 = arith.constant dense<0.000000e+00> : vector<32xf32>
    %105 = vector.multi_reduction <add>, %104, %cst_37 [1] : vector<32x32xf32> to vector<32xf32>
    %106 = vector.shape_cast %105 : vector<32xf32> to vector<32x1xf32>
    %107 = tpu.reciprocal %106 {approx = true} : vector<32x1xf32> -> vector<32x1xf32>
    %108 = vector.broadcast %107 : vector<32x1xf32> to vector<32x32xf32>
    %109 = arith.mulf %104, %108 : vector<32x32xf32>
    %cst_38 = arith.constant dense<0.000000e+00> : vector<32x128xf32>
    %110 = tpu.matmul %109, %86, %cst_38 {dimension_numbers = #tpu.dot_dimension_numbers<[1], [0], [0], [1], [0, 0, 1, 1], [], []>} : vector<32x32xf32>, vector<32x128xf32>, vector<32x128xf32> -> vector<32x128xf32>
    %111 = vector.extract_strided_slice %88 {offsets = [0, 1], sizes = [32, 1], strides = [1, 1]} : vector<32x2xf32> to vector<32x1xf32>
    %112 = vector.extract_strided_slice %90 {offsets = [1, 0], sizes = [1, 32], strides = [1, 1]} : vector<2x32xf32> to vector<1x32xf32>
    %113 = vector.broadcast %111 : vector<32x1xf32> to vector<32x32xf32>
    %114 = vector.broadcast %112 : vector<1x32xf32> to vector<32x32xf32>
    %115 = arith.addf %113, %114 : vector<32x32xf32>
    %cst_39 = arith.constant 2.000000e-01 : f32
    %116 = vector.broadcast %cst_39 : f32 to vector<32x32xf32>
    %117 = arith.mulf %116, %115 : vector<32x32xf32>
    %118 = arith.maximumf %115, %117 : vector<32x32xf32>
    %119 = arith.addf %118, %9 : vector<32x32xf32>
    %cst_40 = arith.constant dense<0xFF800000> : vector<32xf32>
    %120 = vector.multi_reduction <maximumf>, %119, %cst_40 [1] : vector<32x32xf32> to vector<32xf32>
    %121 = vector.shape_cast %120 : vector<32xf32> to vector<32x1xf32>
    %122 = vector.broadcast %121 : vector<32x1xf32> to vector<32x32xf32>
    %123 = arith.subf %119, %122 : vector<32x32xf32>
    %124 = math.exp %123 : vector<32x32xf32>
    %cst_41 = arith.constant dense<0.000000e+00> : vector<32xf32>
    %125 = vector.multi_reduction <add>, %124, %cst_41 [1] : vector<32x32xf32> to vector<32xf32>
    %126 = vector.shape_cast %125 : vector<32xf32> to vector<32x1xf32>
    %127 = tpu.reciprocal %126 {approx = true} : vector<32x1xf32> -> vector<32x1xf32>
    %128 = vector.broadcast %127 : vector<32x1xf32> to vector<32x32xf32>
    %129 = arith.mulf %124, %128 : vector<32x32xf32>
    %cst_42 = arith.constant dense<0.000000e+00> : vector<32x128xf32>
    %130 = tpu.matmul %129, %86, %cst_42 {dimension_numbers = #tpu.dot_dimension_numbers<[1], [0], [0], [1], [0, 0, 1, 1], [], []>} : vector<32x32xf32>, vector<32x128xf32>, vector<32x128xf32> -> vector<32x128xf32>
    %c8_i32 = arith.constant 8 : i32
    %131 = vector.broadcast %c8_i32 : i32 to vector<32x128xi32>
    %132 = arith.cmpi slt, %4, %131 : vector<32x128xi32>
    %133 = arith.select %132, %110, %130 : vector<32x128xi1>, vector<32x128xf32>
    %134 = vector.extract_strided_slice %133 {offsets = [0, 0], sizes = [32, 16], strides = [1, 1]} : vector<32x128xf32> to vector<32x16xf32>
    %c256 = arith.constant 256 : index
    %c0_43 = arith.constant 0 : index
    %135 = vector.load %arg0[%c256, %c0_43] : memref<280x128xf32, #tpu.memory_space<vmem>>, vector<16x128xf32>
    %cst_44 = arith.constant dense<0.000000e+00> : vector<32x128xf32>
    %136 = tpu.matmul %134, %135, %cst_44 {dimension_numbers = #tpu.dot_dimension_numbers<[1], [0], [0], [1], [0, 0, 1, 1], [], []>} : vector<32x16xf32>, vector<16x128xf32>, vector<32x128xf32> -> vector<32x128xf32>
    %cst_45 = arith.constant 5.000000e-01 : f32
    %137 = vector.broadcast %cst_45 : f32 to vector<32x128xf32>
    %138 = arith.mulf %137, %136 : vector<32x128xf32>
    %c272 = arith.constant 272 : index
    %c0_46 = arith.constant 0 : index
    %139 = vector.load %arg0[%c272, %c0_46] : memref<280x128xf32, #tpu.memory_space<vmem>>, vector<1x128xf32>
    %140 = vector.broadcast %139 : vector<1x128xf32> to vector<32x128xf32>
    %141 = arith.addf %138, %140 : vector<32x128xf32>
    %cst_47 = arith.constant dense<0xFF800000> : vector<32xf32>
    %142 = vector.multi_reduction <maximumf>, %141, %cst_47 [1] : vector<32x128xf32> to vector<32xf32>
    %143 = vector.shape_cast %142 : vector<32xf32> to vector<32x1xf32>
    %144 = vector.broadcast %143 : vector<32x1xf32> to vector<32x128xf32>
    %145 = arith.subf %141, %144 : vector<32x128xf32>
    %146 = math.exp %145 : vector<32x128xf32>
    %cst_48 = arith.constant dense<0.000000e+00> : vector<32xf32>
    %147 = vector.multi_reduction <add>, %146, %cst_48 [1] : vector<32x128xf32> to vector<32xf32>
    %148 = vector.shape_cast %147 : vector<32xf32> to vector<32x1xf32>
    %149 = math.log %148 : vector<32x1xf32>
    %150 = vector.broadcast %149 : vector<32x1xf32> to vector<32x128xf32>
    %151 = arith.subf %145, %150 : vector<32x128xf32>
    %c0_49 = arith.constant 0 : index
    %c0_50 = arith.constant 0 : index
    %152 = vector.load %arg1[%c0_49, %c0_50] : memref<32x128xf32, #tpu.memory_space<vmem>>, vector<32x128xf32>
    tpu.vector_store %arg1[%c0_49, %c0_50], %151 {strides = array<i32>} : memref<32x128xf32, #tpu.memory_space<vmem>>, vector<32x128xf32>,
    return
  }
}

</mosaic_0001>

<bundles_post_ra>
// kernel: gcn_with_attention.1
= control target key start
LH: loop header
LB: loop body
LE: loop exit
PB: predicated region body
PF: predicated region fallthrough
CT: control target
= control target key end

     0   :  { %6 = vsyncpa [#allocation3], 0  ;;  %s2605_s0 = inlined_call_operand.hbm [shape: f32[280,128], index: 0, kind: input, shape index: {}]   ;;  %s2606_s1 = inlined_call_operand.hbm [shape: f32[32,128], index: 1, kind: output, shape index: {}]  }
   0x1   :  { %7 = vsyncpa [#allocation4], 0  ;;  %s2383_s6 = smov [#allocation2]   ;;  %s2335_s10 = scalar_lea.hbm %s2605_s0, 4480 }
   0x2   :  { %s13_s7 = sshll.u32 %s2383_s6, 4  ;;  %p2336_p0 = scmp.ne.s32.totalorder %s2605_s0, %s2335_s10  ;;  %s14_s7 = int_to_ptr.vmem [resolvable:$true] %s13_s7 }
   0x3   :  { %p2339_p1 = scmp.lt.u32.totalorder %s2335_s10, %s2605_s0 }
   0x5   :  { %p2341_p2 = pnand %p2339_p1, %p2336_p0 }
   0x7   :  { %2344 = shalt.err (!%p2341_p2)
}
   0x8   :  { %s2345_s15 = scalar_lea.vmem %s14_s7, 4480  ;;  %p2350_p4 = scmp.lt.s32.totalorder %s14_s7, %s14_s7 }
   0x9   :  { %p2346_p3 = scmp.ne.s32.totalorder %s14_s7, %s2345_s15  ;;  %p2351_p5 = scmp.lt.s32.totalorder %s2345_s15, %s2345_s15 }
   0xb   :  { %p2352_p6 = por %p2351_p5, %p2350_p4 }
   0xd   :  { %p2353_p7 = pnand %p2352_p6, %p2346_p3 }
   0xf   :  { %2356 = shalt.err (!%p2353_p7)
}
  0x10   :  { %s2384_s16 = smov 128   ;;  %s2385_s17 = smov 8  }
  0x11   :  { %19 = dma.hbm_to_vmem [thread:$0]  %s2605_s0, 4480, %s14_s7, [#allocation3], %s2384_s16, %s2384_s16, %s2385_s17  }
  0x12   :  { %2379 = dma.done.wait [#allocation3], 4480  }
  0x13   :  { %2380 = vsyncadd [#allocation3], 4294962816  ;;  %vm41_vm0 = vcmask 261120   ;;  %v27_v0 = vld [vmem:[#allocation2 + $0x20] sm:$0xff]  ;;  %v28_v1 = vld [vmem:[#allocation2 + $0x28] sm:$0xff]  ;;  %v2386_v10 = vmov 0  }
  0x14   :  { %v29_v2 = vld [vmem:[#allocation2 + $0x30] sm:$0xff]  ;;  %v2139_v3 = vpack.c.bf16 %v28_v1, %v27_v0  ;;  %v30_v4 = vld [vmem:[#allocation2 + $0x38] sm:$0xff]  ;;  %v2418_v5 = vld [vmem:[#allocation2] sm:$0xff]  ;;  %2245 = vset.pattern.permute.xlu0 %v2386_v10  ;;  %2246 = vset.pattern.permute.xlu1 %v2386_v10  ;;  %v2387_v1 = vmov 0.0|0.0   ;;  %vm2388_vm1 = vmmov 0   ;;  %vm1018_vm7 = vcmask 523264  }
  0x15   :  { %v2143_v6 = vpack.c.bf16 %v30_v4, %v29_v2  ;;  %1965 = vmatprep.mubr.msk.f32.mxu0 %vm41_vm0, %v2418_v5  ;;  %v2422_v7 = vld [vmem:[#allocation2 + $0x8] sm:$0xff]  ;;  %v2424_v8 = vld [vmem:[#allocation2 + $0x10] sm:$0xff]  ;;  %v2430_v9 = vld [vmem:[#allocation2 + $0x18] sm:$0xff]  ;;  %v2389_v2 = vmov 0.0   ;;  %vm33_vm3 = vcmp.gt.f32.partialorder %v2418_v5, 0.0  ;;  %vm1638_vm9 = vcmask 130048  }
  0x16   :  { %2140 = vmatprep.subr.bf16.mxu0 %v2139_v3  ;;  %v181_v13 = vld [vmem:[#allocation2 + $0x50] sm:$0xff]  ;;  %v182_v14 = vld [vmem:[#allocation2 + $0x58] sm:$0xff]  ;;  %v183_v18 = vld [vmem:[#allocation2 + $0x60] sm:$0xff]  ;;  %vm34_vm2 = vcmp.gt.f32.partialorder %v2422_v7, 0.0  ;;  %vm36_vm4 = vcmp.gt.f32.partialorder %v2430_v9, 0.0  ;;  %vm35_vm5 = vcmp.gt.f32.partialorder %v2424_v8, 0.0 }
  0x17   :  { %2142 = vmatpush3.bf16.msra.mxu0 %v2139_v3  ;;  %v2147_v15 = vpack.c.bf16 %v182_v14, %v181_v13  ;;  %v184_v19 = vld [vmem:[#allocation2 + $0x68] sm:$0xff]  ;;  %v1814_v21 = vld [vmem:[#allocation2 + $0x40] ss:$0 sm:$0xff]  ;;  %v376_v39 = vld [vmem:[#allocation2 + $0x78] sm:$0xff]  ;;  %s2392_s0 = smov [#allocation5]  }
  0x18   :  { %2144 = vmatprep.subr.bf16.mxu0 %v2143_v6  ;;  %v2151_v20 = vpack.c.bf16 %v184_v19, %v183_v18  ;;  %v1815_v23 = vld [vmem:[#allocation2 + $0x48] ss:$0 sm:$0xff]  ;;  %v377_v40 = vld [vmem:[#allocation2 + $0x80] sm:$0xff]  ;;  %v379_v49 = vld [vmem:[#allocation2 + $0x90] sm:$0xff]  ;;  %v2390_v19 = vmov 1   ;;  %s1798_s20 = sshll.u32 %s2392_s0, 4  ;;  %s1799_s20 = int_to_ptr.vmem [resolvable:$true] %s1798_s20 }
  0x19   :  { %2148 = vmatprep.subr.bf16.mxu1 %v2147_v15  ;;  %v2163_v41 = vpack.c.bf16 %v377_v40, %v376_v39  ;;  %v378_v48 = vld [vmem:[#allocation2 + $0x88] sm:$0xff]  ;;  %v477_v51 = vld [vmem:[#allocation2 + $0x98] sm:$0x3]  ;;  %v1820_v52 = vld [vmem:[#allocation2 + $0x70] ss:$0 sm:$0xff]  ;;  %s2357_s21 = scalar_lea.vmem %s1799_s20, 512  ;;  %p2362_p9 = scmp.lt.s32.totalorder %s1799_s20, %s1799_s20 }
  0x1a   :  { %2150 = vmatpush3.bf16.msra.mxu1 %v2147_v15  ;;  %v2167_v50 = vpack.c.bf16 %v379_v49, %v378_v48  ;;  %v563_v14 = vld [vmem:[#allocation2 + $0xa0] sm:$0x3]  ;;  %p2358_p8 = scmp.ne.s32.totalorder %s1799_s20, %s2357_s21  ;;  %p2363_p10 = scmp.lt.s32.totalorder %s2357_s21, %s2357_s21 }
  0x1b   :  { %2146 = vmatpush3.bf16.msra.mxu0 %v2143_v6  ;;  %2152 = vmatprep.subr.bf16.mxu1 %v2151_v20 }
  0x1c   :  { %p2364_p11 = por %p2363_p10, %p2362_p9 }
  0x1e   :  { %1966 = vmatmul.mubr.msk.f32.vlgmr.msra.gmra.mrb[0].mxu0 %vm41_vm0, %v2422_v7  ;;  %2154 = vmatpush3.bf16.msra.mxu1 %v2151_v20  ;;  %p2365_p12 = pnand %p2364_p11, %p2358_p8 }
  0x1f   :  { %1968 = vmatprep.mubr.msk.f32.mxu0 %vm41_vm0, %v2424_v8  ;;  %2164 = vmatprep.subr.bf16.mxu1 %v2163_v41 }
  0x22   :  { %1969 = vmatmul.mubr.msk.f32.gmra.mrb[2].mxu0 %vm41_vm0, %v2430_v9 }
  0x23   :  { %1993 = vmatprep.mubr.msk.f32.mxu0 %vm41_vm0, %v2418_v5 }
  0xf1   :  { %v1967_v11 = vpop.f32.mrb[0].mxu0 }
  0xf2   :  { %v120_v12 = vpop.f32.mrb[1].mxu0 }
  0xf3   :  { %142 = vperm.xlu0 %2245, %v120_v12  }
  0xf5   :  { %v1970_v16 = vpop.f32.mrb[2].mxu0 }
  0xf6   :  { %v130_v17 = vpop.f32.mrb[3].mxu0 }
  0xf7   :  { %147 = vperm.xlu0 %2245, %v1967_v11   ;;  %152 = vperm.xlu1 %2246, %v130_v17  }
  0xfb   :  { %157 = vperm.xlu1 %2246, %v1970_v16  }
 0x172   :  { %v143_v22 = vpop.permute.xlu0 %142 }
 0x173   :  { %v164_v24 = vmul.f32 %v1814_v21, %v143_v22  ;;  %v31_v22 = vlaneseq }
 0x175   :  { %v173_v25 = vadd.f32 %v1815_v23, %v164_v24 }
 0x176   :  { %v148_v26 = vpop.permute.xlu0 %147  ;;  %v153_v27 = vpop.permute.xlu1 %152 }
 0x177   :  { %v165_v28 = vmul.f32 %v1814_v21, %v148_v26  ;;  %v166_v29 = vmul.f32 %v1814_v21, %v153_v27  ;;  %v177_v30 = vmax.f32 %v173_v25, 0.0 }
 0x179   :  { %v174_v31 = vadd.f32 %v1815_v23, %v165_v28  ;;  %v175_v32 = vadd.f32 %v1815_v23, %v166_v29  ;;  %1979 = vmatprep.mubr.msk.f32.mxu1 %vm41_vm0, %v177_v30 }
 0x17a   :  { %v158_v33 = vpop.permute.xlu1 %157 }
 0x17b   :  { %v178_v34 = vmax.f32 %v174_v31, 0.0  ;;  %v179_v35 = vmax.f32 %v175_v32, 0.0  ;;  %v167_v36 = vmul.f32 %v1814_v21, %v158_v33 }
 0x17d   :  { %v176_v37 = vadd.f32 %v1815_v23, %v167_v36  ;;  %1980 = vmatmul.mubr.msk.f32.vlgmr.msra.gmra.mrb[0].mxu1 %vm41_vm0, %v178_v34  ;;  %v2472_v23 = vshrl.u32 %v31_v22, 7  ;;  %v2391_v34 = vmov -1e+30  }
 0x17e   :  { %1982 = vmatprep.mubr.msk.f32.mxu1 %vm41_vm0, %v179_v35  ;;  %2166 = vmatpush3.bf16.msra.mxu1 %v2163_v41  ;;  %v2480_v35 = vsel %vm34_vm2, 0.0, %v2391_v34  ;;  %v2482_v36 = vsel %vm33_vm3, 0.0, %v2391_v34  ;;  %v2493_v48 = vsel %vm35_vm5, 0.0, %v2391_v34 }
 0x17f   :  { %v180_v38 = vmax.f32 %v176_v37, 0.0  ;;  %2168 = vmatprep.subr.bf16.mxu1 %v2167_v50  ;;  %v656_v24 = vsub.s32 0, %v2472_v23  ;;  %v833_v31 = vsub.s32 1, %v2472_v23 }
 0x181   :  { %1983 = vmatmul.mubr.msk.f32.gmra.mrb[2].mxu1 %vm41_vm0, %v180_v38 }
 0x182   :  { %2170 = vmatpush3.bf16.msra.mxu1 %v2167_v50 }
 0x183   :  { %2171 = vmatprep.subr.bf16.mxu1 %v2387_v1 }
 0x250   :  { %v1981_v42 = vpop.f32.mrb[0].mxu1 }
 0x251   :  { %v263_v43 = vpop.f32.mrb[1].mxu1 }
 0x252   :  { %v2155_v44 = vpack.c.bf16 %v1981_v42, %v263_v43 }
 0x254   :  { %v1984_v45 = vpop.f32.mrb[2].mxu1  ;;  %2156 = vmatprep.subr.bf16.mxu0 %v2155_v44 }
 0x255   :  { %v273_v46 = vpop.f32.mrb[3].mxu1  ;;  %2158 = vmatpush3.bf16.msra.mxu0 %v2155_v44 }
 0x256   :  { %v2159_v47 = vpack.c.bf16 %v1984_v45, %v273_v46  ;;  %v2490_v45 = vsel %vm36_vm4, 0.0, %v2391_v34 }
 0x258   :  { %2160 = vmatprep.subr.bf16.mxu0 %v2159_v47 }
 0x259   :  { %2162 = vmatpush3.bf16.msra.mxu0 %v2159_v47 }
 0x25a   :  { %2013 = vmatprep.subr.mxu0 %v477_v51 }
 0x25c   :  { %1994 = vmatmul.mubr.msk.f32.vlgmr.msra.gmra.mrb[4].mxu0 %vm41_vm0, %v2422_v7 }
 0x25d   :  { %1996 = vmatprep.mubr.msk.f32.mxu0 %vm41_vm0, %v2424_v8 }
 0x260   :  { %1997 = vmatmul.mubr.msk.f32.gmra.mrb[6].mxu0 %vm41_vm0, %v2430_v9 }
 0x262   :  { %2014 = vmatpush3.xpose.msra.mxu0 %v477_v51 }
 0x32f   :  { %v1995_v53 = vpop.f32.mrb[4].mxu0 }
 0x330   :  { %v359_v54 = vadd.f32 %v1995_v53, %v1820_v52  ;;  %v353_v55 = vpop.f32.mrb[5].mxu0 }
 0x331   :  { %v354_v56 = vadd.f32 %v1820_v52, %v353_v55 }
 0x332   :  { %v373_v59 = vmax.f32 %v359_v54, 0.0 }
 0x333   :  { %v372_v57 = vmax.f32 %v354_v56, 0.0  ;;  %v1998_v58 = vpop.f32.mrb[6].mxu0 }
 0x334   :  { %v369_v60 = vadd.f32 %v1998_v58, %v1820_v52  ;;  %v363_v61 = vpop.f32.mrb[7].mxu0 }
 0x335   :  { %v364_v62 = vadd.f32 %v1820_v52, %v363_v61  ;;  %2007 = vmatprep.mubr.msk.f32.mxu1 %vm41_vm0, %v372_v57 }
 0x336   :  { %2008 = vmatmul.mubr.msk.f32.vlgmr.msra.gmra.mrb[4].mxu1 %vm41_vm0, %v373_v59  ;;  %v375_v0 = vmax.f32 %v369_v60, 0.0 }
 0x337   :  { %v374_v63 = vmax.f32 %v364_v62, 0.0 }
 0x339   :  { %2010 = vmatprep.mubr.msk.f32.mxu1 %vm41_vm0, %v374_v63 }
 0x33a   :  { %2011 = vmatmul.mubr.msk.f32.gmra.mrb[6].mxu1 %vm41_vm0, %v375_v0 }
 0x33b   :  { %2029 = vmatprep.mubr.msk.f32.mxu1 %vm2388_vm1, %v2389_v2 }
 0x409   :  { %v2009_v3 = vpop.f32.mrb[4].mxu1 }
 0x40a   :  { %v458_v4 = vpop.f32.mrb[5].mxu1 }
 0x40b   :  { %v2455_v6 = vpack.c.bf16 %v2009_v3, %v458_v4  ;;  %2015 = vmatprep.mubr.f32.mxu0 %v458_v4 }
 0x40c   :  { %2016 = vmatmul.mubr.f32.vlgmr.msra.gmra.mrb[8].mxu0 %v2009_v3 }
 0x40d   :  { %v2012_v11 = vpop.f32.mrb[6].mxu1  ;;  %2173 = vmatpush3.bf16.xpose.msra.mxu1 %v2455_v6  ;;  %2178 = vmatprep.subr.bf16.mxu0 %v2455_v6 }
 0x40e   :  { %v468_v12 = vpop.f32.mrb[7].mxu1  ;;  %2180 = vmatpush3.bf16.msra.mxu0 %v2455_v6  ;;  %2174 = vmatprep.subr.bf16.mxu1 %v2387_v1 }
 0x40f   :  { %v2461_v13 = vpack.c.bf16 %v2012_v11, %v468_v12  ;;  %2018 = vmatprep.mubr.f32.mxu0 %v468_v12 }
 0x410   :  { %2019 = vmatmul.mubr.f32.gmra.mrb[10].mxu0 %v2012_v11 }
 0x411   :  { %2182 = vmatprep.subr.bf16.mxu0 %v2461_v13 }
 0x412   :  { %2184 = vmatpush3.bf16.msra.mxu0 %v2461_v13 }
 0x413   :  { %2186 = vmatprep.subr.bf16.mxu0 %v2455_v6 }
 0x415   :  { %2176 = vmatpush3.bf16.xpose.msra.mxu1 %v2461_v13 }
 0x41c   :  { %2030 = vmatmul.mubr.f32.vlgmr.msra.gmra.mrb[8].mxu1 %v563_v14 }
 0x4df   :  { %v2017_v15 = vpop.f32.mrb[8].mxu0 }
 0x4e0   :  { %641 = vperm.xlu1 %2246, %v2017_v15   ;;  %v544_v16 = vpop.f32.mrb[9].mxu0 }
 0x4e1   :  { %636 = vperm.xlu0 %2245, %v544_v16  }
 0x4e3   :  { %v2020_v17 = vpop.f32.mrb[10].mxu0 }
 0x4e4   :  { %651 = vperm.xlu1 %2246, %v2020_v17   ;;  %v554_v18 = vpop.f32.mrb[11].mxu0 }
 0x4e5   :  { %646 = vperm.xlu0 %2245, %v554_v18  }
 0x4e8   :  { %2248 = vset.pattern.permute.xlu1 %v2390_v19 }
 0x4e9   :  { %820 = vperm.xlu1 %2248, %v2017_v15   ;;  %2247 = vset.pattern.permute.xlu0 %v2390_v19 }
 0x4ea   :  { %816 = vperm.xlu0 %2247, %v544_v16  }
 0x4ed   :  { %824 = vperm.xlu1 %2248, %v554_v18  }
 0x4ee   :  { %828 = vperm.xlu0 %2247, %v2020_v17  }
 0x4ef   :  { %v630_v20 = vpop.f32.mrb[8].mxu1 }
 0x4f0   :  { %v2031_v21 = vpop.f32.mrb[9].mxu1  ;;  %v657_v25 = vrot.slane %v630_v20, %v656_v24  ;;  %v834_v42 = vrot.slane %v630_v20, %v833_v31 }
 0x4f1   :  { %2250 = vset.pattern.permute.xlu1 %v2386_v10 }
 0x4f2   :  { %2249 = vset.pattern.permute.xlu0 %v2386_v10 }
 0x55f   :  { %v642_v26 = vpop.permute.xlu1 %641 }
 0x560   :  { %v659_v27 = vadd.f32 %v657_v25, %v642_v26  ;;  %v637_v28 = vpop.permute.xlu0 %636 }
 0x561   :  { %v658_v29 = vadd.f32 %v657_v25, %v637_v28 }
 0x562   :  { %v663_v30 = vmul.f32 0.2, %v659_v27 }
 0x563   :  { %v662_v32 = vmul.f32 0.2, %v658_v29  ;;  %v652_v33 = vpop.permute.xlu1 %651 }
 0x564   :  { %v667_v37 = vmax.f32 %v659_v27, %v663_v30  ;;  %v661_v38 = vadd.f32 %v657_v25, %v652_v33  ;;  %v647_v7 = vpop.permute.xlu0 %646 }
 0x565   :  { %v666_v39 = vmax.f32 %v658_v29, %v662_v32  ;;  %v660_v5 = vadd.f32 %v657_v25, %v647_v7 }
 0x566   :  { %v665_v40 = vmul.f32 0.2, %v661_v38  ;;  %v671_v41 = vadd.f32 %v667_v37, %v2480_v35 }
 0x567   :  { %v664_v43 = vmul.f32 0.2, %v660_v5  ;;  %v670_v44 = vadd.f32 %v666_v39, %v2482_v36 }
 0x568   :  { %v669_v46 = vmax.f32 %v661_v38, %v665_v40  ;;  %v821_v9 = vpop.permute.xlu1 %820  ;;  %v677_v47 = vsel %vm41_vm0, %v671_v41, -inf }
 0x569   :  { %v668_v8 = vmax.f32 %v660_v5, %v664_v43  ;;  %v836_v49 = vadd.f32 %v834_v42, %v821_v9  ;;  %678 = vmax.xlane.f32.xlu0 %v677_v47  ;;  %v817_v50 = vpop.permute.xlu0 %816  ;;  %v674_v51 = vsel %vm41_vm0, %v670_v44, -inf }
 0x56a   :  { %v835_v52 = vadd.f32 %v834_v42, %v817_v50  ;;  %675 = vmax.xlane.f32.xlu1 %v674_v51  ;;  %v673_v53 = vadd.f32 %v669_v46, %v2490_v45 }
 0x56b   :  { %v840_v54 = vmul.f32 0.2, %v836_v49  ;;  %v672_v55 = vadd.f32 %v668_v8, %v2493_v48 }
 0x56c   :  { %v839_v56 = vmul.f32 0.2, %v835_v52  ;;  %v825_v57 = vpop.permute.xlu1 %824  ;;  %v683_v58 = vsel %vm41_vm0, %v673_v53, -inf }
 0x56d   :  { %v844_v59 = vmax.f32 %v836_v49, %v840_v54  ;;  %v837_v60 = vadd.f32 %v834_v42, %v825_v57  ;;  %v829_v61 = vpop.permute.xlu0 %828  ;;  %v680_v62 = vsel %vm41_vm0, %v672_v55, -inf }
 0x56e   :  { %v843_v63 = vmax.f32 %v835_v52, %v839_v56  ;;  %v838_v0 = vadd.f32 %v834_v42, %v829_v61  ;;  %681 = vmax.xlane.f32.xlu0 %v680_v62  ;;  %684 = vmax.xlane.f32.xlu1 %v683_v58 }
 0x56f   :  { %v841_v3 = vmul.f32 0.2, %v837_v60  ;;  %v848_v4 = vadd.f32 %v844_v59, %v2480_v35 }
 0x570   :  { %v842_v11 = vmul.f32 0.2, %v838_v0  ;;  %v847_v12 = vadd.f32 %v843_v63, %v2482_v36 }
 0x571   :  { %v845_v14 = vmax.f32 %v837_v60, %v841_v3  ;;  %v854_v15 = vsel %vm41_vm0, %v848_v4, -inf }
 0x572   :  { %v846_v16 = vmax.f32 %v838_v0, %v842_v11  ;;  %855 = vmax.xlane.f32.xlu1 %v854_v15  ;;  %v851_v17 = vsel %vm41_vm0, %v847_v12, -inf }
 0x573   :  { %852 = vmax.xlane.f32.xlu0 %v851_v17  ;;  %v849_v18 = vadd.f32 %v845_v14, %v2493_v48 }
 0x574   :  { %v850_v20 = vadd.f32 %v846_v16, %v2490_v45 }
 0x575   :  { %v857_v21 = vsel %vm41_vm0, %v849_v18, -inf }
 0x576   :  { %v860_v25 = vsel %vm41_vm0, %v850_v20, -inf }
 0x577   :  { %858 = vmax.xlane.f32.xlu0 %v857_v21  ;;  %861 = vmax.xlane.f32.xlu1 %v860_v25 }
 0x5f6   :  { %v679_v26 = vpop.xlane.xlu0 %678 }
 0x5f7   :  { %v687_v27 = vsub.f32 %v671_v41, %v679_v26  ;;  %v676_v28 = vpop.xlane.xlu1 %675 }
 0x5f8   :  { %v686_v29 = vsub.f32 %v670_v44, %v676_v28 }
 0x5f9   :  { %v692_v30 = vmul.f32 1.442695, %v687_v27 }
 0x5fa   :  { %v690_v32 = vmul.f32 1.442695, %v686_v29 }
 0x5fb   :  { %2255 = vpow2.f32 %v692_v30  ;;  %v682_v33 = vpop.xlane.xlu0 %681  ;;  %v685_v34 = vpop.xlane.xlu1 %684 }
 0x5fc   :  { %2257 = vpow2.f32 %v690_v32  ;;  %v688_v37 = vsub.f32 %v672_v55, %v682_v33  ;;  %v689_v38 = vsub.f32 %v673_v53, %v685_v34 }
 0x5fe   :  { %v694_v7 = vmul.f32 1.442695, %v688_v37  ;;  %v696_v39 = vmul.f32 1.442695, %v689_v38 }
 0x5ff   :  { %v856_v5 = vpop.xlane.xlu1 %855 }
 0x600   :  { %2259 = vpow2.f32 %v694_v7  ;;  %v864_v40 = vsub.f32 %v848_v4, %v856_v5  ;;  %v853_v42 = vpop.xlane.xlu0 %852 }
 0x601   :  { %2261 = vpow2.f32 %v696_v39  ;;  %v863_v43 = vsub.f32 %v847_v12, %v853_v42  ;;  %v1011_v42 = vld [vmem:[#allocation2 + $0xb8] sm:$0xff] }
 0x602   :  { %v869_v46 = vmul.f32 1.442695, %v864_v40  ;;  %v1010_v40 = vld [vmem:[#allocation2 + $0xb0] sm:$0xff] }
 0x603   :  { %v867_v41 = vmul.f32 1.442695, %v863_v43  ;;  %v2193_v43 = vpack.c.bf16 %v1011_v42, %v1010_v40 }
 0x604   :  { %2263 = vpow2.f32 %v869_v46  ;;  %v859_v44 = vpop.xlane.xlu0 %858  ;;  %v862_v9 = vpop.xlane.xlu1 %861  ;;  %v1013_v46 = vld [vmem:[#allocation2 + $0xc8] sm:$0xff] }
 0x605   :  { %v2256_v47 = vpop.eup %2255  ;;  %2265 = vpow2.f32 %v867_v41  ;;  %v865_v8 = vsub.f32 %v849_v18, %v859_v44  ;;  %v866_v49 = vsub.f32 %v850_v20, %v862_v9  ;;  %2194 = vmatprep.subr.bf16.mxu1 %v2193_v43  ;;  %v1014_v44 = vld [vmem:[#allocation2 + $0xd0] sm:$0xff]  ;;  %v1015_v9 = vld [vmem:[#allocation2 + $0xd8] sm:$0xff] }
 0x606   :  { %v2258_v50 = vpop.eup %2257  ;;  %v701_v51 = vsel %vm41_vm0, %v2256_v47, 0.0  ;;  %2196 = vmatpush3.bf16.msra.mxu1 %v2193_v43 }
 0x607   :  { %v871_v52 = vmul.f32 1.442695, %v865_v8  ;;  %v873_v53 = vmul.f32 1.442695, %v866_v49  ;;  %702 = vadd.xlane.f32.xlu1 %v701_v51  ;;  %v698_v54 = vsel %vm41_vm0, %v2258_v50, 0.0  ;;  %v1016_v8 = vld [vmem:[#allocation2 + $0xe0] sm:$0xff] }
 0x608   :  { %699 = vadd.xlane.f32.xlu0 %v698_v54  ;;  %v1017_v49 = vld [vmem:[#allocation2 + $0xe8] sm:$0xff]  ;;  %v1116_v51 = vld [vmem:[#allocation2 + $0xf0] sm:$0x3] }
 0x609   :  { %2267 = vpow2.f32 %v871_v52 }
 0x60a   :  { %v2260_v55 = vpop.eup %2259  ;;  %2269 = vpow2.f32 %v873_v53 }
 0x60b   :  { %v2262_v56 = vpop.eup %2261  ;;  %v704_v57 = vsel %vm41_vm0, %v2260_v55, 0.0 }
 0x60c   :  { %705 = vadd.xlane.f32.xlu0 %v704_v57  ;;  %v707_v58 = vsel %vm41_vm0, %v2262_v56, 0.0  ;;  %v1837_v57 = vld [vmem:[#allocation2 + $0xa8] ss:$0 sm:$0xff] }
 0x60d   :  { %708 = vadd.xlane.f32.xlu1 %v707_v58 }
 0x60e   :  { %v2264_v59 = vpop.eup %2263 }
 0x60f   :  { %v2266_v60 = vpop.eup %2265  ;;  %v878_v61 = vsel %vm41_vm0, %v2264_v59, 0.0 }
 0x610   :  { %v875_v62 = vsel %vm41_vm0, %v2266_v60, 0.0 }
 0x611   :  { %879 = vadd.xlane.f32.xlu1 %v878_v61  ;;  %876 = vadd.xlane.f32.xlu0 %v875_v62 }
 0x613   :  { %v2268_v63 = vpop.eup %2267 }
 0x614   :  { %v2270_v0 = vpop.eup %2269  ;;  %v881_v3 = vsel %vm41_vm0, %v2268_v63, 0.0 }
 0x615   :  { %882 = vadd.xlane.f32.xlu0 %v881_v3  ;;  %v884_v4 = vsel %vm41_vm0, %v2270_v0, 0.0 }
 0x616   :  { %885 = vadd.xlane.f32.xlu1 %v884_v4 }
 0x694   :  { %v703_v11 = vpop.xlane.xlu1 %702 }
 0x695   :  { %2271 = vrcp.f32 %v703_v11  ;;  %v700_v12 = vpop.xlane.xlu0 %699 }
 0x696   :  { %2273 = vrcp.f32 %v700_v12 }
 0x699   :  { %v706_v14 = vpop.xlane.xlu0 %705 }
 0x69a   :  { %2275 = vrcp.f32 %v706_v14  ;;  %v709_v15 = vpop.xlane.xlu1 %708 }
 0x69b   :  { %2277 = vrcp.f32 %v709_v15 }
 0x69e   :  { %v880_v16 = vpop.xlane.xlu1 %879  ;;  %v877_v17 = vpop.xlane.xlu0 %876 }
 0x69f   :  { %v2272_v18 = vpop.eup %2271  ;;  %2279 = vrcp.f32 %v880_v16 }
 0x6a0   :  { %v2274_v20 = vpop.eup %2273  ;;  %2281 = vrcp.f32 %v877_v17  ;;  %v715_v25 = vmul.f32 %v2272_v18, %v2256_v47  ;;  %v2201_v47 = vpack.c.bf16 %v1015_v9, %v1014_v44 }
 0x6a1   :  { %v714_v21 = vmul.f32 %v2274_v20, %v2258_v50  ;;  %v2205_v50 = vpack.c.bf16 %v1017_v49, %v1016_v8 }
 0x6a2   :  { %v883_v26 = vpop.xlane.xlu0 %882 }
 0x6a3   :  { %2283 = vrcp.f32 %v883_v26  ;;  %v886_v27 = vpop.xlane.xlu1 %885  ;;  %2040 = vmatprep.mubr.msk.f32.mxu0 %vm41_vm0, %v714_v21 }
 0x6a4   :  { %v2276_v28 = vpop.eup %2275  ;;  %2285 = vrcp.f32 %v886_v27  ;;  %2041 = vmatmul.mubr.msk.f32.vlgmr.msra.gmra.mrb[12].mxu0 %vm41_vm0, %v715_v25 }
 0x6a5   :  { %v2278_v29 = vpop.eup %2277  ;;  %2188 = vmatpush3.bf16.msra.mxu0 %v2455_v6  ;;  %v716_v30 = vmul.f32 %v2276_v28, %v2260_v55  ;;  %v2529_v55 = vand.u32 127, %v31_v22  ;;  %v1202_v28 = vld [vmem:[#allocation2 + $0xf8] sm:$0x3] }
 0x6a6   :  { %2190 = vmatprep.subr.bf16.mxu0 %v2461_v13  ;;  %v717_v32 = vmul.f32 %v2278_v29, %v2262_v56 }
 0x6a7   :  { %2043 = vmatprep.mubr.msk.f32.mxu0 %vm41_vm0, %v716_v30  ;;  %vm992_vm6 = vcmp.lt.s32.totalorder %v2529_v55, 32  ;;  %vm1631_vm8 = vcmp.lt.s32.totalorder %v2529_v55, 8 }
 0x6a8   :  { %2044 = vmatmul.mubr.msk.f32.gmra.mrb[14].mxu0 %vm41_vm0, %v717_v32 }
 0x6a9   :  { %v2280_v33 = vpop.eup %2279  ;;  %2192 = vmatpush3.bf16.msra.mxu0 %v2461_v13  ;;  %v1012_v13 = vld [vmem:[#allocation2 + $0xc0] sm:$0xff] }
 0x6aa   :  { %v2282_v34 = vpop.eup %2281  ;;  %v892_v38 = vmul.f32 %v2280_v33, %v2264_v59  ;;  %v2197_v41 = vpack.c.bf16 %v1013_v46, %v1012_v13  ;;  %2082 = vmatprep.subr.mxu0 %v1116_v51 }
 0x6ab   :  { %v891_v37 = vmul.f32 %v2282_v34, %v2266_v60 }
 0x6ac   :  { %2198 = vmatprep.subr.bf16.mxu1 %v2197_v41 }
 0x6ad   :  { %v2284_v7 = vpop.eup %2283  ;;  %2054 = vmatprep.mubr.msk.f32.mxu0 %vm41_vm0, %v891_v37  ;;  %2200 = vmatpush3.bf16.msra.mxu1 %v2197_v41 }
 0x6ae   :  { %v2286_v39 = vpop.eup %2285  ;;  %2055 = vmatmul.mubr.msk.f32.vlgmr.msra.gmra.mrb[16].mxu0 %vm41_vm0, %v892_v38  ;;  %v893_v6 = vmul.f32 %v2284_v7, %v2268_v63  ;;  %2202 = vmatprep.subr.bf16.mxu1 %v2201_v47 }
 0x6af   :  { %v894_v5 = vmul.f32 %v2286_v39, %v2270_v0 }
 0x6b0   :  { %2057 = vmatprep.mubr.msk.f32.mxu0 %vm41_vm0, %v893_v6 }
 0x6b1   :  { %2204 = vmatpush3.bf16.msra.mxu1 %v2201_v47 }
 0x6b2   :  { %2058 = vmatmul.mubr.msk.f32.gmra.mrb[18].mxu0 %vm41_vm0, %v894_v5  ;;  %2206 = vmatprep.subr.bf16.mxu1 %v2205_v50 }
 0x6b3   :  { %2083 = vmatpush3.xpose.msra.mxu0 %v1116_v51 }
 0x6b4   :  { %2209 = vmatprep.subr.bf16.mxu0 %v2387_v1 }
 0x6b5   :  { %2208 = vmatpush3.bf16.msra.mxu1 %v2205_v50 }
 0x777   :  { %v2042_v52 = vpop.f32.mrb[12].mxu0 }
 0x778   :  { %v796_v53 = vpop.f32.mrb[13].mxu0 }
 0x77b   :  { %v2045_v54 = vpop.f32.mrb[14].mxu0 }
 0x77c   :  { %v806_v56 = vpop.f32.mrb[15].mxu0 }
 0x781   :  { %v2056_v58 = vpop.f32.mrb[16].mxu0 }
 0x782   :  { %v994_v59 = vsel %vm992_vm6, %v2042_v52, %v2056_v58  ;;  %v973_v60 = vpop.f32.mrb[17].mxu0 }
 0x783   :  { %v1003_v61 = vadd.f32 %v1837_v57, %v994_v59  ;;  %v993_v62 = vsel %vm992_vm6, %v796_v53, %v973_v60 }
 0x784   :  { %v1002_v63 = vadd.f32 %v1837_v57, %v993_v62 }
 0x785   :  { %v2059_v0 = vpop.f32.mrb[18].mxu0  ;;  %v1007_v12 = vmax.f32 %v1003_v61, 0.0 }
 0x786   :  { %v1006_v3 = vmax.f32 %v1002_v63, 0.0  ;;  %v996_v4 = vsel %vm992_vm6, %v2045_v54, %v2059_v0  ;;  %v983_v11 = vpop.f32.mrb[19].mxu0 }
 0x787   :  { %v1005_v14 = vadd.f32 %v1837_v57, %v996_v4  ;;  %v995_v15 = vsel %vm992_vm6, %v806_v56, %v983_v11 }
 0x788   :  { %v1004_v22 = vadd.f32 %v1837_v57, %v995_v15  ;;  %2076 = vmatprep.mubr.msk.f32.mxu1 %vm1018_vm7, %v1006_v3 }
 0x789   :  { %2077 = vmatmul.mubr.msk.f32.vlgmr.msra.gmra.mrb[10].mxu1 %vm1018_vm7, %v1007_v12  ;;  %v1009_v17 = vmax.f32 %v1005_v14, 0.0 }
 0x78a   :  { %v1008_v16 = vmax.f32 %v1004_v22, 0.0 }
 0x78c   :  { %2079 = vmatprep.mubr.msk.f32.mxu1 %vm1018_vm7, %v1008_v16 }
 0x78d   :  { %2080 = vmatmul.mubr.msk.f32.gmra.mrb[12].mxu1 %vm1018_vm7, %v1009_v17 }
 0x85c   :  { %v2078_v18 = vpop.f32.mrb[10].mxu1 }
 0x85d   :  { %v1097_v20 = vpop.f32.mrb[11].mxu1 }
 0x85e   :  { %v2532_v21 = vpack.c.bf16 %v2078_v18, %v1097_v20  ;;  %2084 = vmatprep.mubr.f32.mxu0 %v1097_v20 }
 0x85f   :  { %2085 = vmatmul.mubr.f32.vlgmr.msra.gmra.mrb[20].mxu0 %v2078_v18 }
 0x860   :  { %v2081_v25 = vpop.f32.mrb[12].mxu1  ;;  %2211 = vmatpush3.bf16.xpose.msra.mxu0 %v2532_v21  ;;  %2216 = vmatprep.subr.bf16.mxu1 %v2532_v21 }
 0x861   :  { %v1107_v26 = vpop.f32.mrb[13].mxu1  ;;  %2218 = vmatpush3.bf16.msra.mxu1 %v2532_v21  ;;  %2212 = vmatprep.subr.bf16.mxu0 %v2387_v1 }
 0x862   :  { %v2538_v27 = vpack.c.bf16 %v2081_v25, %v1107_v26  ;;  %2087 = vmatprep.mubr.f32.mxu0 %v1107_v26 }
 0x863   :  { %2088 = vmatmul.mubr.f32.gmra.mrb[22].mxu0 %v2081_v25 }
 0x864   :  { %2220 = vmatprep.subr.bf16.mxu1 %v2538_v27  ;;  %2098 = vmatprep.mubr.msk.f32.mxu0 %vm2388_vm1, %v2389_v2 }
 0x865   :  { %2222 = vmatpush3.bf16.msra.mxu1 %v2538_v27 }
 0x866   :  { %2224 = vmatprep.subr.bf16.mxu1 %v2532_v21 }
 0x868   :  { %2214 = vmatpush3.bf16.xpose.msra.mxu0 %v2538_v27 }
 0x86f   :  { %2099 = vmatmul.mubr.f32.vlgmr.msra.gmra.mrb[24].mxu0 %v1202_v28 }
 0x932   :  { %v2086_v29 = vpop.f32.mrb[20].mxu0 }
 0x933   :  { %1280 = vperm.xlu1 %2250, %v2086_v29   ;;  %v1183_v1 = vpop.f32.mrb[21].mxu0 }
 0x934   :  { %1275 = vperm.xlu0 %2249, %v1183_v1  }
 0x936   :  { %v2089_v30 = vpop.f32.mrb[22].mxu0 }
 0x937   :  { %2251 = vset.pattern.permute.xlu1 %v2390_v19  ;;  %v1193_v32 = vpop.f32.mrb[23].mxu0 }
 0x938   :  { %1455 = vperm.xlu1 %2251, %v1183_v1   ;;  %2254 = vset.pattern.permute.xlu0 %v2390_v19 }
 0x93c   :  { %2252 = vset.pattern.permute.xlu1 %v2386_v10 }
 0x93d   :  { %1290 = vperm.xlu1 %2252, %v2089_v30  }
 0x941   :  { %1285 = vperm.xlu1 %2252, %v1193_v32  }
 0x942   :  { %v1269_v2 = vpop.f32.mrb[24].mxu0 }
 0x943   :  { %v2100_v33 = vpop.f32.mrb[25].mxu0  ;;  %v1296_v34 = vrot.slane %v1269_v2, %v656_v24  ;;  %v1473_v43 = vrot.slane %v1269_v2, %v833_v31 }
 0x945   :  { %2253 = vset.pattern.permute.xlu1 %v2390_v19 }
 0x946   :  { %1459 = vperm.xlu1 %2253, %v2086_v29  }
 0x94a   :  { %1463 = vperm.xlu1 %2253, %v1193_v32  }
 0x94e   :  { %1467 = vperm.xlu1 %2253, %v2089_v30  }
 0x9b2   :  { %v1281_v37 = vpop.permute.xlu1 %1280 }
 0x9b3   :  { %v1298_v38 = vadd.f32 %v1296_v34, %v1281_v37  ;;  %v1276_v7 = vpop.permute.xlu0 %1275 }
 0x9b4   :  { %v1297_v39 = vadd.f32 %v1296_v34, %v1276_v7 }
 0x9b5   :  { %v1302_v6 = vmul.f32 0.2, %v1298_v38 }
 0x9b6   :  { %v1301_v5 = vmul.f32 0.2, %v1297_v39 }
 0x9b7   :  { %v1306_v40 = vmax.f32 %v1298_v38, %v1302_v6  ;;  %v1456_v10 = vpop.permute.xlu1 %1455 }
 0x9b8   :  { %v1305_v42 = vmax.f32 %v1297_v39, %v1301_v5  ;;  %v1474_v44 = vadd.f32 %v1473_v43, %v1456_v10 }
 0x9b9   :  { %v1310_v19 = vadd.f32 %v1306_v40, %v2480_v35 }
 0x9ba   :  { %v1309_v13 = vadd.f32 %v1305_v42, %v2482_v36  ;;  %v1478_v49 = vmul.f32 0.2, %v1474_v44 }
 0x9bb   :  { %v1316_v46 = vsel %vm41_vm0, %v1310_v19, -inf }
 0x9bc   :  { %v1291_v41 = vpop.permute.xlu1 %1290  ;;  %1317 = vmax.xlane.f32.xlu0 %v1316_v46  ;;  %v1313_v24 = vsel %vm41_vm0, %v1309_v13, -inf  ;;  %v1482_v52 = vmax.f32 %v1474_v44, %v1478_v49 }
 0x9bd   :  { %v1300_v9 = vadd.f32 %v1296_v34, %v1291_v41  ;;  %1314 = vmax.xlane.f32.xlu1 %v1313_v24 }
 0x9be   :  { %v1486_v62 = vadd.f32 %v1482_v52, %v2482_v36 }
 0x9bf   :  { %v1304_v47 = vmul.f32 0.2, %v1300_v9 }
 0x9c0   :  { %v1286_v8 = vpop.permute.xlu1 %1285  ;;  %v1490_v12 = vsel %vm41_vm0, %v1486_v62, -inf }
 0x9c1   :  { %v1308_v50 = vmax.f32 %v1300_v9, %v1304_v47  ;;  %v1299_v51 = vadd.f32 %v1296_v34, %v1286_v8 }
 0x9c3   :  { %v1303_v23 = vmul.f32 0.2, %v1299_v51  ;;  %v1312_v31 = vadd.f32 %v1308_v50, %v2490_v45 }
 0x9c5   :  { %v1307_v53 = vmax.f32 %v1299_v51, %v1303_v23  ;;  %v1460_v54 = vpop.permute.xlu1 %1459  ;;  %v1322_v56 = vsel %vm41_vm0, %v1312_v31, -inf }
 0x9c6   :  { %v1475_v57 = vadd.f32 %v1473_v43, %v1460_v54  ;;  %1323 = vmax.xlane.f32.xlu1 %v1322_v56 }
 0x9c7   :  { %v1311_v58 = vadd.f32 %v1307_v53, %v2493_v48 }
 0x9c8   :  { %v1479_v59 = vmul.f32 0.2, %v1475_v57 }
 0x9c9   :  { %v1464_v60 = vpop.permute.xlu1 %1463  ;;  %v1319_v61 = vsel %vm41_vm0, %v1311_v58, -inf }
 0x9ca   :  { %v1483_v63 = vmax.f32 %v1475_v57, %v1479_v59  ;;  %v1476_v0 = vadd.f32 %v1473_v43, %v1464_v60  ;;  %1320 = vmax.xlane.f32.xlu0 %v1319_v61 }
 0x9cc   :  { %v1480_v3 = vmul.f32 0.2, %v1476_v0  ;;  %v1487_v4 = vadd.f32 %v1483_v63, %v2480_v35 }
 0x9cd   :  { %v1468_v11 = vpop.permute.xlu1 %1467 }
 0x9ce   :  { %v1484_v14 = vmax.f32 %v1476_v0, %v1480_v3  ;;  %v1477_v15 = vadd.f32 %v1473_v43, %v1468_v11  ;;  %1491 = vmax.xlane.f32.xlu0 %v1490_v12  ;;  %v1493_v22 = vsel %vm41_vm0, %v1487_v4, -inf }
 0x9cf   :  { %1494 = vmax.xlane.f32.xlu1 %v1493_v22 }
 0x9d0   :  { %v1481_v16 = vmul.f32 0.2, %v1477_v15  ;;  %v1488_v17 = vadd.f32 %v1484_v14, %v2493_v48 }
 0x9d2   :  { %v1485_v18 = vmax.f32 %v1477_v15, %v1481_v16  ;;  %v1496_v36 = vsel %vm41_vm0, %v1488_v17, -inf }
 0x9d3   :  { %1497 = vmax.xlane.f32.xlu0 %v1496_v36 }
 0x9d4   :  { %v1489_v20 = vadd.f32 %v1485_v18, %v2490_v45 }
 0x9d6   :  { %v1499_v35 = vsel %vm41_vm0, %v1489_v20, -inf }
 0x9d7   :  { %1500 = vmax.xlane.f32.xlu1 %v1499_v35 }
 0xa49   :  { %v1318_v25 = vpop.xlane.xlu0 %1317 }
 0xa4a   :  { %v1326_v26 = vsub.f32 %v1310_v19, %v1318_v25  ;;  %v1315_v28 = vpop.xlane.xlu1 %1314 }
 0xa4b   :  { %v1325_v29 = vsub.f32 %v1309_v13, %v1315_v28  ;;  %v1637_v28 = vld [vmem:[#allocation2 + $0x108] sm:$0xff] }
 0xa4c   :  { %v1331_v1 = vmul.f32 1.442695, %v1326_v26  ;;  %v1636_v26 = vld [vmem:[#allocation2 + $0x100] sm:$0xff] }
 0xa4d   :  { %v1329_v30 = vmul.f32 1.442695, %v1325_v29  ;;  %v2231_v29 = vpack.c.bf16 %v1637_v28, %v1636_v26 }
 0xa4e   :  { %2287 = vpow2.f32 %v1331_v1 }
 0xa4f   :  { %2289 = vpow2.f32 %v1329_v30  ;;  %2232 = vmatprep.subr.bf16.mxu0 %v2231_v29 }
 0xa50   :  { %2234 = vmatpush3.bf16.msra.mxu0 %v2231_v29 }
 0xa53   :  { %v1324_v32 = vpop.xlane.xlu1 %1323 }
 0xa54   :  { %v1328_v2 = vsub.f32 %v1312_v31, %v1324_v32 }
 0xa56   :  { %v1335_v48 = vmul.f32 1.442695, %v1328_v2 }
 0xa57   :  { %v1321_v33 = vpop.xlane.xlu0 %1320 }
 0xa58   :  { %v2288_v34 = vpop.eup %2287  ;;  %2291 = vpow2.f32 %v1335_v48  ;;  %v1327_v37 = vsub.f32 %v1311_v58, %v1321_v33 }
 0xa59   :  { %v2290_v38 = vpop.eup %2289  ;;  %v1340_v45 = vsel %vm41_vm0, %v2288_v34, 0.0 }
 0xa5a   :  { %v1333_v7 = vmul.f32 1.442695, %v1327_v37  ;;  %1341 = vadd.xlane.f32.xlu1 %v1340_v45  ;;  %v1337_v39 = vsel %vm41_vm0, %v2290_v38, 0.0 }
 0xa5b   :  { %v1492_v6 = vpop.xlane.xlu0 %1491  ;;  %1338 = vadd.xlane.f32.xlu0 %v1337_v39 }
 0xa5c   :  { %2293 = vpow2.f32 %v1333_v7  ;;  %v1502_v5 = vsub.f32 %v1486_v62, %v1492_v6  ;;  %v1495_v40 = vpop.xlane.xlu1 %1494 }
 0xa5d   :  { %v1503_v10 = vsub.f32 %v1487_v4, %v1495_v40 }
 0xa5e   :  { %v1506_v42 = vmul.f32 1.442695, %v1502_v5  ;;  %v1854_v5 = vld [vmem:[#allocation2 + $0x110] ss:$0 sm:$0xff] }
 0xa5f   :  { %v1508_v43 = vmul.f32 1.442695, %v1503_v10 }
 0xa60   :  { %2295 = vpow2.f32 %v1506_v42  ;;  %v1498_v19 = vpop.xlane.xlu0 %1497 }
 0xa61   :  { %2297 = vpow2.f32 %v1508_v43  ;;  %v1504_v13 = vsub.f32 %v1488_v17, %v1498_v19 }
 0xa62   :  { %v2292_v46 = vpop.eup %2291 }
 0xa63   :  { %v1510_v41 = vmul.f32 1.442695, %v1504_v13  ;;  %v1346_v24 = vsel %vm41_vm0, %v2292_v46, 0.0 }
 0xa64   :  { %1347 = vadd.xlane.f32.xlu1 %v1346_v24  ;;  %v1501_v44 = vpop.xlane.xlu1 %1500 }
 0xa65   :  { %2299 = vpow2.f32 %v1510_v41  ;;  %v1505_v9 = vsub.f32 %v1489_v20, %v1501_v44 }
 0xa66   :  { %v2294_v47 = vpop.eup %2293 }
 0xa67   :  { %v1512_v8 = vmul.f32 1.442695, %v1505_v9  ;;  %v1343_v49 = vsel %vm41_vm0, %v2294_v47, 0.0 }
 0xa68   :  { %1344 = vadd.xlane.f32.xlu0 %v1343_v49 }
 0xa69   :  { %2301 = vpow2.f32 %v1512_v8 }
 0xa6a   :  { %v2296_v50 = vpop.eup %2295 }
 0xa6b   :  { %v2298_v51 = vpop.eup %2297  ;;  %v1514_v23 = vsel %vm41_vm0, %v2296_v50, 0.0 }
 0xa6c   :  { %1515 = vadd.xlane.f32.xlu0 %v1514_v23  ;;  %v1517_v31 = vsel %vm41_vm0, %v2298_v51, 0.0 }
 0xa6d   :  { %1518 = vadd.xlane.f32.xlu1 %v1517_v31 }
 0xa6f   :  { %v2300_v52 = vpop.eup %2299 }
 0xa70   :  { %v1520_v53 = vsel %vm41_vm0, %v2300_v52, 0.0 }
 0xa71   :  { %1521 = vadd.xlane.f32.xlu0 %v1520_v53 }
 0xa73   :  { %v2302_v54 = vpop.eup %2301 }
 0xa74   :  { %v1523_v56 = vsel %vm41_vm0, %v2302_v54, 0.0 }
 0xa75   :  { %1524 = vadd.xlane.f32.xlu1 %v1523_v56 }
 0xae7   :  { %v1342_v57 = vpop.xlane.xlu1 %1341 }
 0xae8   :  { %2303 = vrcp.f32 %v1342_v57  ;;  %v1339_v58 = vpop.xlane.xlu0 %1338 }
 0xae9   :  { %2305 = vrcp.f32 %v1339_v58 }
 0xaf1   :  { %v1348_v60 = vpop.xlane.xlu1 %1347 }
 0xaf2   :  { %v2304_v59 = vpop.eup %2303  ;;  %2307 = vrcp.f32 %v1348_v60 }
 0xaf3   :  { %v2306_v61 = vpop.eup %2305  ;;  %v1354_v63 = vmul.f32 %v2304_v59, %v2288_v34 }
 0xaf4   :  { %v1353_v62 = vmul.f32 %v2306_v61, %v2290_v38 }
 0xaf5   :  { %v1345_v0 = vpop.xlane.xlu0 %1344 }
 0xaf6   :  { %2309 = vrcp.f32 %v1345_v0  ;;  %2109 = vmatprep.mubr.msk.f32.mxu1 %vm41_vm0, %v1353_v62 }
 0xaf7   :  { %2110 = vmatmul.mubr.msk.f32.vlgmr.msra.gmra.mrb[14].mxu1 %vm41_vm0, %v1354_v63 }
 0xaf8   :  { %2226 = vmatpush3.bf16.msra.mxu1 %v2532_v21 }
 0xaf9   :  { %2228 = vmatprep.subr.bf16.mxu1 %v2538_v27  ;;  %v1516_v3 = vpop.xlane.xlu0 %1515 }
 0xafa   :  { %2311 = vrcp.f32 %v1516_v3  ;;  %v1519_v4 = vpop.xlane.xlu1 %1518 }
 0xafb   :  { %2313 = vrcp.f32 %v1519_v4 }
 0xafc   :  { %2230 = vmatpush3.bf16.msra.mxu1 %v2538_v27  ;;  %v2308_v12 = vpop.eup %2307 }
 0xafd   :  { %v1356_v16 = vmul.f32 %v2308_v12, %v2292_v46 }
 0xafe   :  { %v1522_v11 = vpop.xlane.xlu0 %1521 }
 0xaff   :  { %2315 = vrcp.f32 %v1522_v11 }
 0xb00   :  { %v2310_v14 = vpop.eup %2309 }
 0xb01   :  { %v1355_v15 = vmul.f32 %v2310_v14, %v2294_v47 }
 0xb02   :  { %v1525_v22 = vpop.xlane.xlu1 %1524 }
 0xb03   :  { %2317 = vrcp.f32 %v1525_v22  ;;  %2112 = vmatprep.mubr.msk.f32.mxu1 %vm41_vm0, %v1355_v15 }
 0xb04   :  { %v2312_v17 = vpop.eup %2311  ;;  %2113 = vmatmul.mubr.msk.f32.gmra.mrb[16].mxu1 %vm41_vm0, %v1356_v16 }
 0xb05   :  { %v2314_v21 = vpop.eup %2313  ;;  %v1530_v18 = vmul.f32 %v2312_v17, %v2296_v50 }
 0xb06   :  { %v1531_v36 = vmul.f32 %v2314_v21, %v2298_v51 }
 0xb07   :  { %2123 = vmatprep.mubr.msk.f32.mxu1 %vm41_vm0, %v1530_v18 }
 0xb08   :  { %2124 = vmatmul.mubr.msk.f32.vlgmr.msra.gmra.mrb[18].mxu1 %vm41_vm0, %v1531_v36 }
 0xb09   :  { %v2316_v27 = vpop.eup %2315 }
 0xb0a   :  { %v1532_v20 = vmul.f32 %v2316_v27, %v2300_v52 }
 0xb0c   :  { %2126 = vmatprep.mubr.msk.f32.mxu1 %vm41_vm0, %v1532_v20 }
 0xb0d   :  { %v2318_v35 = vpop.eup %2317 }
 0xb0e   :  { %v1533_v25 = vmul.f32 %v2318_v35, %v2302_v54 }
 0xb10   :  { %2127 = vmatmul.mubr.msk.f32.gmra.mrb[20].mxu1 %vm41_vm0, %v1533_v25 }
 0xbca   :  { %v2111_v1 = vpop.f32.mrb[14].mxu1 }
 0xbcb   :  { %v1435_v30 = vpop.f32.mrb[15].mxu1 }
 0xbd7   :  { %v2114_v32 = vpop.f32.mrb[16].mxu1 }
 0xbd8   :  { %v1445_v2 = vpop.f32.mrb[17].mxu1 }
 0xbdb   :  { %v2125_v48 = vpop.f32.mrb[18].mxu1 }
 0xbdc   :  { %v1633_v33 = vsel %vm1631_vm8, %v2111_v1, %v2125_v48  ;;  %v1612_v34 = vpop.f32.mrb[19].mxu1 }
 0xbdd   :  { %v1632_v37 = vsel %vm1631_vm8, %v1435_v30, %v1612_v34 }
 0xbde   :  { %2133 = vmatprep.mubr.msk.f32.mxu0 %vm1638_vm9, %v1632_v37 }
 0xbdf   :  { %2134 = vmatmul.mubr.msk.f32.vlgmr.msra.gmra.mrb[26].mxu0 %vm1638_vm9, %v1633_v33 }
 0xbe3   :  { %v2128_v38 = vpop.f32.mrb[20].mxu1 }
 0xbe4   :  { %v1635_v45 = vsel %vm1631_vm8, %v2114_v32, %v2128_v38  ;;  %v1622_v7 = vpop.f32.mrb[21].mxu1 }
 0xbe5   :  { %v1634_v39 = vsel %vm1631_vm8, %v1445_v2, %v1622_v7 }
 0xbe6   :  { %2136 = vmatprep.mubr.msk.f32.mxu0 %vm1638_vm9, %v1634_v39 }
 0xbe7   :  { %2137 = vmatmul.mubr.msk.f32.gmra.mrb[28].mxu0 %vm1638_vm9, %v1635_v45 }
 0xcb2   :  { %v2135_v6 = vpop.f32.mrb[26].mxu0 }
 0xcb3   :  { %v1737_v40 = vmul.f32 0.5, %v2135_v6  ;;  %v1717_v10 = vpop.f32.mrb[27].mxu0 }
 0xcb4   :  { %v1736_v42 = vmul.f32 0.5, %v1717_v10 }
 0xcb5   :  { %v1746_v43 = vadd.f32 %v1854_v5, %v1737_v40 }
 0xcb6   :  { %v1745_v55 = vadd.f32 %v1854_v5, %v1736_v42 }
 0xcb7   :  { %1751 = vmax.xlane.f32.xlu1 %v1746_v43 }
 0xcb8   :  { %1749 = vmax.xlane.f32.xlu0 %v1745_v55 }
 0xcba   :  { %v2138_v19 = vpop.f32.mrb[28].mxu0 }
 0xcbb   :  { %v1739_v13 = vmul.f32 0.5, %v2138_v19  ;;  %v1727_v46 = vpop.f32.mrb[29].mxu0 }
 0xcbc   :  { %v1738_v41 = vmul.f32 0.5, %v1727_v46 }
 0xcbd   :  { %v1748_v24 = vadd.f32 %v1854_v5, %v1739_v13 }
 0xcbe   :  { %v1747_v44 = vadd.f32 %v1854_v5, %v1738_v41 }
 0xcbf   :  { %1755 = vmax.xlane.f32.xlu1 %v1748_v24 }
 0xcc0   :  { %1753 = vmax.xlane.f32.xlu0 %v1747_v44 }
 0xd44   :  { %v1752_v9 = vpop.xlane.xlu1 %1751 }
 0xd45   :  { %v1758_v47 = vsub.f32 %v1746_v43, %v1752_v9  ;;  %v1750_v8 = vpop.xlane.xlu0 %1749 }
 0xd46   :  { %v1757_v49 = vsub.f32 %v1745_v55, %v1750_v8 }
 0xd47   :  { %v1763_v50 = vmul.f32 1.442695, %v1758_v47 }
 0xd48   :  { %v1761_v51 = vmul.f32 1.442695, %v1757_v49 }
 0xd49   :  { %2319 = vpow2.f32 %v1763_v50 }
 0xd4a   :  { %2321 = vpow2.f32 %v1761_v51 }
 0xd4c   :  { %v1756_v23 = vpop.xlane.xlu1 %1755 }
 0xd4d   :  { %v1760_v31 = vsub.f32 %v1748_v24, %v1756_v23  ;;  %v1754_v52 = vpop.xlane.xlu0 %1753 }
 0xd4e   :  { %v1759_v53 = vsub.f32 %v1747_v44, %v1754_v52 }
 0xd4f   :  { %v1767_v54 = vmul.f32 1.442695, %v1760_v31 }
 0xd50   :  { %v1765_v56 = vmul.f32 1.442695, %v1759_v53 }
 0xd51   :  { %2323 = vpow2.f32 %v1767_v54 }
 0xd52   :  { %2325 = vpow2.f32 %v1765_v56 }
 0xd53   :  { %v2320_v57 = vpop.eup %2319 }
 0xd54   :  { %v2322_v58 = vpop.eup %2321  ;;  %1771 = vadd.xlane.f32.xlu1 %v2320_v57 }
 0xd55   :  { %1769 = vadd.xlane.f32.xlu0 %v2322_v58 }
 0xd5b   :  { %v2324_v59 = vpop.eup %2323 }
 0xd5c   :  { %v2326_v60 = vpop.eup %2325  ;;  %1775 = vadd.xlane.f32.xlu1 %v2324_v59 }
 0xd5d   :  { %1773 = vadd.xlane.f32.xlu0 %v2326_v60 }
 0xde1   :  { %v1772_v61 = vpop.xlane.xlu1 %1771 }
 0xde2   :  { %2327 = vlog2.f32 %v1772_v61  ;;  %v1770_v62 = vpop.xlane.xlu0 %1769 }
 0xde3   :  { %2329 = vlog2.f32 %v1770_v62 }
 0xde9   :  { %v1776_v63 = vpop.xlane.xlu1 %1775 }
 0xdea   :  { %2331 = vlog2.f32 %v1776_v63  ;;  %v1774_v0 = vpop.xlane.xlu0 %1773 }
 0xdeb   :  { %2333 = vlog2.f32 %v1774_v0 }
 0xdec   :  { %v2328_v3 = vpop.eup %2327 }
 0xded   :  { %v2330_v4 = vpop.eup %2329  ;;  %v1780_v11 = vmul.f32 0.6931472, %v2328_v3 }
 0xdee   :  { %v1778_v12 = vmul.f32 0.6931472, %v2330_v4 }
 0xdef   :  { %v1786_v14 = vsub.f32 %v1758_v47, %v1780_v11 }
 0xdf0   :  { %v1785_v15 = vsub.f32 %v1757_v49, %v1778_v12 }
 0xdf1   :  { %1790 = vst [vmem:[#allocation5 + $0x8] sm:$0xff] %v1786_v14 }
 0xdf2   :  { %1789 = vst [vmem:[#allocation5] sm:$0xff] %v1785_v15 }
 0xdf4   :  { %v2332_v22 = vpop.eup %2331 }
 0xdf5   :  { %v2334_v16 = vpop.eup %2333  ;;  %v1784_v17 = vmul.f32 0.6931472, %v2332_v22 }
 0xdf6   :  { %v1782_v21 = vmul.f32 0.6931472, %v2334_v16 }
 0xdf7   :  { %v1788_v18 = vsub.f32 %v1760_v31, %v1784_v17 }
 0xdf8   :  { %v1787_v36 = vsub.f32 %v1759_v53, %v1782_v21 }
 0xdf9   :  { %1792 = vst [vmem:[#allocation5 + $0x18] sm:$0xff] %v1788_v18 }
 0xdfa   :  { %1791 = vst [vmem:[#allocation5 + $0x10] sm:$0xff] %v1787_v36 }
 0xdfb   :  { %2368 = shalt.err (!%p2365_p12)
}
 0xdfc   :  { %s2369_s24 = scalar_lea.hbm %s2606_s1, 512 }
 0xdfd   :  { %p2370_p13 = scmp.ne.s32.totalorder %s2606_s1, %s2369_s24  ;;  %p2373_p0 = scmp.lt.u32.totalorder %s2369_s24, %s2606_s1 }
 0xdff   :  { %p2375_p1 = pnand %p2373_p0, %p2370_p13 }
 0xe01   :  { %2378 = shalt.err (!%p2375_p1)
}
 0xe02   :  { %1804 = dma.vmem_to_hbm [thread:$0]  %s1799_s20, 512, %s2606_s1, [#allocation4], %s2384_s16, %s2384_s16, %s2385_s17  }
 0xe03   :  { %2381 = dma.done.wait [#allocation4], 512  }
 0xe04   :  { %2382 = vsyncadd [#allocation4], 4294966784 }
 0xe05   :  { %1808 = vsyncpa [#allocation3], 1 }
 0xe06   :  { %1809 = vsyncpa [#allocation4], 1 }

</bundles_post_ra>
